<compile_context>
chip_gen: v5e
topology: v5e:2x2
jax: 0.10.0
libtpu: 0.0.40
codegen_flags: <defaults>
</compile_context>

<pallas_src>
import jax
import jax.numpy as jnp
from jax.experimental import pallas as pl
from jax.experimental.pallas import tpu as pltpu


def _round_up(x, m):
    return (x + m - 1) // m * m


# ---------------------------------------------------------------------------
# Kernel: one grid step == one GRU layer
# ---------------------------------------------------------------------------
def make_encoder_kernel(seq, Hp, Kp, unroll_limit=32):
    """Build the per-layer kernel for a static (seq, Hp, Kp) configuration.

    Ref order: x0, wih, bx, whh, bhn, h0  ->  out, hN, scratch gx_buf.
      x0   (seq, Kp)  bf16 : embedded tokens (layer-0 input)
      wih  (Kp, 3Hp)  bf16 : fused r|z|n input weights of this layer
      bx   (1, 3Hp)   f32  : [b_ir+b_hr, b_iz+b_hz, b_in] (pre-folded)
      whh  (Kp, 3Hp)  bf16 : fused r|z|n hidden weights of this layer
      bhn  (1, Hp)    f32  : b_hn only (must stay inside the r-multiplied term)
      h0   (1, Hp)    f32  : initial hidden of this layer
      out  (seq, Hp)  f32  : resident block; doubles as inter-layer activation
      hN   (1, Hp)    f32  : final hidden of this layer
      gx_buf (seq, 3Hp) f32: hoisted input-projection result
    """
    H3 = 3 * Hp

    def kernel(x0_ref, wih_ref, bx_ref, whh_ref, bhn_ref, h0_ref,
               out_ref, hN_ref, gx_buf):
        l = pl.program_id(0)

        # ---- input projection hoisted out of the recurrence: ONE MXU matmul.
        # Layer 0 reads the embedded tokens; layers >= 1 read the previous
        # layer's output, which is still resident in the `out` block (same
        # block index every grid step).
        @pl.when(l == 0)
        def _():
            gx_buf[...] = (
                jnp.dot(x0_ref[...], wih_ref[...],
                        preferred_element_type=jnp.float32)
                + bx_ref[...])

        @pl.when(l > 0)
        def _():
            xprev = out_ref[:, :Kp].astype(jnp.bfloat16)
            gx_buf[...] = (
                jnp.dot(xprev, wih_ref[...],
                        preferred_element_type=jnp.float32)
                + bx_ref[...])

        whh = whh_ref[...]        # (Kp, 3Hp) bf16, hoisted out of the time loop
        bhn = bhn_ref[...]        # (1, Hp) f32: hidden bias of the n gate only

        def step(t, h):
            gx = gx_buf[pl.ds(t, 1), :]                        # (1, 3Hp)
            gh = jnp.dot(h[:, :Kp].astype(jnp.bfloat16), whh,
                         preferred_element_type=jnp.float32)   # (1, 3Hp)
            # r and z share a single sigmoid over the contiguous 2Hp slice.
            rz = jax.nn.sigmoid(gx[:, :2 * Hp] + gh[:, :2 * Hp])
            r = rz[:, :Hp]
            z = rz[:, Hp:]
            n = jnp.tanh(gx[:, 2 * Hp:] + r * (gh[:, 2 * Hp:] + bhn))
            h_new = (1.0 - z) * n + z * h
            out_ref[pl.ds(t, 1), :] = h_new                    # lane-dense row store
            return h_new

        h = h0_ref[...]                                        # (1, Hp)
        if seq <= unroll_limit:
            # Fully unroll the short static recurrence so the scheduler can
            # overlap step-t's elementwise tail with step-(t+1)'s MXU push.
            for t in range(seq):
                h = step(t, h)
        else:
            h = jax.lax.fori_loop(0, seq, step, h)
        hN_ref[...] = h

    return kernel


# ---------------------------------------------------------------------------
# Raw parameters (layout identical to the previous versions)
# ---------------------------------------------------------------------------
def init_encoder_params(key, input_size, hidden_size, n_layers=1):
    keys = jax.random.split(key, 1 + 4 * n_layers)
    params = {
        "embedding": jax.random.normal(keys[0], (input_size, hidden_size),
                                       dtype=jnp.float32),
        "layers": [],
    }
    bound = 1.0 / jnp.sqrt(hidden_size)
    for layer in range(n_layers):
        k_wih, k_whh, k_bih, k_bhh = keys[1 + 4 * layer: 5 + 4 * layer]
        params["layers"].append({
            # stored transposed, gate order (r, z, n): gate = x @ W[g]
            "wih": jax.random.uniform(k_wih, (3, hidden_size, hidden_size),
                                      minval=-bound, maxval=bound, dtype=jnp.float32),
            "whh": jax.random.uniform(k_whh, (3, hidden_size, hidden_size),
                                      minval=-bound, maxval=bound, dtype=jnp.float32),
            "bih": jax.random.uniform(k_bih, (3, hidden_size),
                                      minval=-bound, maxval=bound, dtype=jnp.float32),
            "bhh": jax.random.uniform(k_bhh, (3, hidden_size),
                                      minval=-bound, maxval=bound, dtype=jnp.float32),
        })
    return params


def init_hidden(n_layers, hidden_size):
    return jnp.zeros((n_layers, 1, hidden_size), dtype=jnp.float32)


# ---------------------------------------------------------------------------
# One-time parameter preparation (pad + fold biases + bf16 cast)
# ---------------------------------------------------------------------------
def prepare_encoder_params(params):
    """Pad / pre-fold the GRU parameters ONCE for the Pallas kernel.

    NOTE: these buffers are derived data -- re-run this whenever `params`
    change (e.g. after an optimizer step).
    """
    emb = params["embedding"]
    layers = params["layers"]
    n_layers = len(layers)
    _, H = emb.shape
    Hp = _round_up(max(H, 128), 128)   # per-gate output block: lane-dense (128)
    Kp = _round_up(H, 8)               # contraction dim: sublane granule only (8)
    H3 = 3 * Hp

    wih = jnp.zeros((n_layers, Kp, H3), jnp.float32)
    whh = jnp.zeros((n_layers, Kp, H3), jnp.float32)
    bx = jnp.zeros((n_layers, 1, H3), jnp.float32)
    bhn = jnp.zeros((n_layers, 1, Hp), jnp.float32)
    for l, lp in enumerate(layers):
        for g in range(3):
            wih = wih.at[l, :H, g * Hp:g * Hp + H].set(lp["wih"][g])
            whh = whh.at[l, :H, g * Hp:g * Hp + H].set(lp["whh"][g])
        # PyTorch GRU: r/z biases can be pre-summed into the input projection;
        # b_in rides along too, but b_hn must stay inside the r-multiplied term.
        bx = bx.at[l, 0, 0 * Hp:0 * Hp + H].set(lp["bih"][0] + lp["bhh"][0])
        bx = bx.at[l, 0, 1 * Hp:1 * Hp + H].set(lp["bih"][1] + lp["bhh"][1])
        bx = bx.at[l, 0, 2 * Hp:2 * Hp + H].set(lp["bih"][2])
        bhn = bhn.at[l, 0, :H].set(lp["bhh"][2])

    return {
        "emb": emb,                          # (vocab, H) f32, gathered per call
        "wih": wih.astype(jnp.bfloat16),     # bf16 weights: 2x less VMEM + DMA
        "whh": whh.astype(jnp.bfloat16),
        "bx": bx,                            # biases stay f32
        "bhn": bhn,
    }


# ---------------------------------------------------------------------------
# Forward pass: XLA gather of the embedding rows + ONE pallas_call
# ---------------------------------------------------------------------------
@jax.jit
def encoder_rnn_forward(prep, word_inputs, hidden):
    """word_inputs: (seq,) int32, hidden: (n_layers, 1, H) f32.

    Returns (output (seq, 1, H), hidden (n_layers, 1, H)) — same as PyTorch.
    """
    emb = prep["emb"]
    wih, whh, bx, bhn = prep["wih"], prep["whh"], prep["bx"], prep["bhn"]
    n_layers, Kp, H3 = wih.shape
    Hp = H3 // 3
    vocab, H = emb.shape
    seq = word_inputs.shape[0]

    # Pallas does no bounds check on VMEM refs -> out-of-range ids are clamped
    # (silently mapped to 0 / vocab-1) rather than raising.
    ids = jnp.clip(word_inputs.astype(jnp.int32), 0, vocab - 1)

    # Embedding gather in the wrapper: scales with seq, NOT with vocab.
    x0 = jnp.zeros((seq, Kp), jnp.float32).at[:, :H].set(emb[ids])
    x0 = x0.astype(jnp.bfloat16)

    h0 = jnp.zeros((n_layers, 1, Hp), jnp.float32).at[:, :, :H].set(hidden)

    # Scoped-VMEM budget from the actual footprint (+ headroom); defaults are
    # only ~16 MiB (v5e) / 32 MiB (v6e, v7x).
    vmem_bytes = (
        seq * Kp * 2                       # x0 (bf16, resident)
        + seq * Hp * 4                     # out block (resident, reused as input)
        + seq * H3 * 4                     # gx_buf scratch
        + 2 * 2 * (Kp * H3 * 2)            # wih + whh blocks, bf16, double-buffered
        + 2 * (H3 + 3 * Hp) * 4            # bx, bhn, h0, hN blocks, double-buffered
    )
    vmem_limit = int(min(max(2 * vmem_bytes + (4 << 20), 32 << 20), 128 << 20))

    out_pad, hN_pad = pl.pallas_call(
        make_encoder_kernel(seq, Hp, Kp),
        out_shape=(jax.ShapeDtypeStruct((seq, Hp), jnp.float32),
                   jax.ShapeDtypeStruct((n_layers, 1, Hp), jnp.float32)),
        grid=(n_layers,),
        in_specs=[
            pl.BlockSpec((seq, Kp), lambda l: (0, 0)),           # x0 (resident)
            pl.BlockSpec((None, Kp, H3), lambda l: (l, 0, 0)),   # wih[l]
            pl.BlockSpec((None, 1, H3), lambda l: (l, 0, 0)),    # bx[l]
            pl.BlockSpec((None, Kp, H3), lambda l: (l, 0, 0)),   # whh[l]
            pl.BlockSpec((None, 1, Hp), lambda l: (l, 0, 0)),    # bhn[l]
            pl.BlockSpec((None, 1, Hp), lambda l: (l, 0, 0)),    # h0[l]
        ],
        out_specs=(
            pl.BlockSpec((seq, Hp), lambda l: (0, 0)),           # out (resident)
            pl.BlockSpec((None, 1, Hp), lambda l: (l, 0, 0)),    # hN[l]
        ),
        scratch_shapes=[pltpu.VMEM((seq, H3), jnp.float32)],     # hoisted gates_x
        compiler_params=pltpu.CompilerParams(
            dimension_semantics=("arbitrary",),                  # layers are serial
            vmem_limit_bytes=vmem_limit),
    )(x0, wih, bx, whh, bhn, h0)

    output = out_pad[:, :H].reshape(seq, 1, H)
    hidden_out = hN_pad[:, :, :H]
    return output, hidden_out


# ---------------------------------------------------------------------------
# Pure-JAX references for sanity checks
# ---------------------------------------------------------------------------
def reference_forward(params, word_inputs, hidden, emulate_bf16=False):
    """PyTorch-equivalent GRU math. With emulate_bf16=True the matmul operands
    are rounded to bf16 exactly like the kernel (f32 accumulation)."""
    def q(a):
        return a.astype(jnp.bfloat16).astype(jnp.float32) if emulate_bf16 else a

    x = params["embedding"][word_inputs]  # (seq, H)
    new_hidden = []
    for layer_idx, lp in enumerate(params["layers"]):
        h = hidden[layer_idx]  # (1, H)
        wih = [q(lp["wih"][g]) for g in range(3)]
        whh = [q(lp["whh"][g]) for g in range(3)]

        def step(h, xt):
            xt = q(xt[None, :])
            hq = q(h)
            i_r = xt @ wih[0] + lp["bih"][0]
            i_z = xt @ wih[1] + lp["bih"][1]
            i_n = xt @ wih[2] + lp["bih"][2]
            h_r = hq @ whh[0] + lp["bhh"][0]
            h_z = hq @ whh[1] + lp["bhh"][1]
            h_n = hq @ whh[2] + lp["bhh"][2]
            r = jax.nn.sigmoid(i_r + h_r)
            z = jax.nn.sigmoid(i_z + h_z)
            n = jnp.tanh(i_n + r * h_n)
            h_new = (1.0 - z) * n + z * h
            return h_new, h_new[0]

        h, outs = jax.lax.scan(step, h, x)
        x = outs
        new_hidden.append(h)
    return x[:, None, :], jnp.stack(new_hidden, axis=0)


if __name__ == "__main__":
    INPUT_SIZE = 20    # vocab size
    HIDDEN_SIZE = 32
    SEQ_LEN = 8

    key = jax.random.PRNGKey(0)

    for n_layers in (1, 2):   # exercise both the single- and multi-layer paths
        k_params, k_ids = jax.random.split(jax.random.fold_in(key, n_layers))
        params = init_encoder_params(k_params, INPUT_SIZE, HIDDEN_SIZE, n_layers)
        prep = prepare_encoder_params(params)   # one-time pad / fold / bf16 cast
        word_inputs = jax.random.randint(k_ids, (SEQ_LEN,), 0, INPUT_SIZE,
                                         dtype=jnp.int32)
        hidden = init_hidden(n_layers, HIDDEN_SIZE)

        output, hidden_out = encoder_rnn_forward(prep, word_inputs, hidden)
        output = jax.block_until_ready(output)
        hidden_out = jax.block_until_ready(hidden_out)

        assert output.shape == (SEQ_LEN, 1, HIDDEN_SIZE)
        assert hidden_out.shape == (n_layers, 1, HIDDEN_SIZE)

        # Tight check vs. a reference that applies the same bf16 rounding to
        # the matmul operands as the kernel does.
        ref_q_out, ref_q_hid = reference_forward(params, word_inputs, hidden,
                                                 emulate_bf16=True)
        assert jnp.allclose(output, ref_q_out, atol=2e-3, rtol=2e-3), \
            f"bf16-reference output mismatch (n_layers={n_layers})"
        assert jnp.allclose(hidden_out, ref_q_hid, atol=2e-3, rtol=2e-3), \
            f"bf16-reference hidden mismatch (n_layers={n_layers})"

        # Semantics check vs. the plain f32 reference; tolerance covers the
        # deliberate bf16 weight cast.
        ref_out, ref_hid = reference_forward(params, word_inputs, hidden)
        assert jnp.allclose(output, ref_out, atol=2.5e-2, rtol=2.5e-2), \
            f"f32-reference output mismatch (n_layers={n_layers})"
        assert jnp.allclose(hidden_out, ref_hid, atol=2.5e-2, rtol=2.5e-2), \
            f"f32-reference hidden mismatch (n_layers={n_layers})"

    print("KERNEL_OK")
</pallas_src>

<mosaic_0001>
module attributes {stable_mosaic.version = 11 : i64} {
  func.func @kernel(%arg0: i32, %arg1: memref<8x32xbf16, #tpu.memory_space<vmem>>, %arg2: memref<1x32x384xbf16, #tpu.memory_space<vmem>>, %arg3: memref<1x1x384xf32, #tpu.memory_space<vmem>>, %arg4: memref<1x32x384xbf16, #tpu.memory_space<vmem>>, %arg5: memref<1x1x128xf32, #tpu.memory_space<vmem>>, %arg6: memref<1x1x128xf32, #tpu.memory_space<vmem>>, %arg7: memref<8x128xf32, #tpu.memory_space<vmem>>, %arg8: memref<1x1x128xf32, #tpu.memory_space<vmem>>, %arg9: memref<8x384xf32, #tpu.memory_space<vmem>>) attributes {dimension_semantics = [#tpu.dimension_semantics<arbitrary>], iteration_bounds = array<i64: 1>, scalar_prefetch = 0 : i64, scratch_operands = 1 : i64, tpu.core_type = #tpu.core_type<tc>, window_params = [{pipeline_mode = #tpu.pipeline_mode<synchronous>, transform_indices = @transform_0, window_bounds = array<i64: 8, 32>}, {transform_indices = @transform_1, window_bounds = array<i64: 1, 32, 384>}, {transform_indices = @transform_2, window_bounds = array<i64: 1, 1, 384>}, {transform_indices = @transform_3, window_bounds = array<i64: 1, 32, 384>}, {transform_indices = @transform_4, window_bounds = array<i64: 1, 1, 128>}, {transform_indices = @transform_5, window_bounds = array<i64: 1, 1, 128>}, {pipeline_mode = #tpu.pipeline_mode<synchronous>, transform_indices = @transform_6, window_bounds = array<i64: 8, 128>}, {transform_indices = @transform_7, window_bounds = array<i64: 1, 1, 128>}]} {
    %c0_i32 = arith.constant 0 : i32
    %0 = arith.cmpi eq, %arg0, %c0_i32 : i32
    %1 = arith.extui %0 : i1 to i32
    %c0_i32_0 = arith.constant 0 : i32
    %2 = arith.cmpi ne, %1, %c0_i32_0 : i32
    scf.if %2 {
      %c0_62 = arith.constant 0 : index
      %c0_63 = arith.constant 0 : index
      %223 = vector.load %arg1[%c0_62, %c0_63] : memref<8x32xbf16, #tpu.memory_space<vmem>>, vector<8x32xbf16>
      %c0_64 = arith.constant 0 : index
      %c0_65 = arith.constant 0 : index
      %c0_66 = arith.constant 0 : index
      %224 = vector.load %arg2[%c0_64, %c0_65, %c0_66] : memref<1x32x384xbf16, #tpu.memory_space<vmem>>, vector<1x32x384xbf16>
      %225 = vector.shape_cast %224 : vector<1x32x384xbf16> to vector<32x384xbf16>
      %cst_67 = arith.constant dense<0.000000e+00> : vector<8x384xf32>
      %226 = tpu.matmul %223, %225, %cst_67 {dimension_numbers = #tpu.dot_dimension_numbers<[1], [0], [0], [1], [0, 0, 1, 1], [], []>} : vector<8x32xbf16>, vector<32x384xbf16>, vector<8x384xf32> -> vector<8x384xf32>
      %c0_68 = arith.constant 0 : index
      %c0_69 = arith.constant 0 : index
      %c0_70 = arith.constant 0 : index
      %227 = vector.load %arg3[%c0_68, %c0_69, %c0_70] : memref<1x1x384xf32, #tpu.memory_space<vmem>>, vector<1x1x384xf32>
      %228 = vector.shape_cast %227 : vector<1x1x384xf32> to vector<1x384xf32>
      %229 = vector.broadcast %228 : vector<1x384xf32> to vector<8x384xf32>
      %230 = arith.addf %226, %229 : vector<8x384xf32>
      %c0_71 = arith.constant 0 : index
      %c0_72 = arith.constant 0 : index
      %231 = vector.load %arg9[%c0_71, %c0_72] : memref<8x384xf32, #tpu.memory_space<vmem>>, vector<8x384xf32>
      tpu.vector_store %arg9[%c0_71, %c0_72], %230 {strides = array<i32>} : memref<8x384xf32, #tpu.memory_space<vmem>>, vector<8x384xf32>,
    } else {
    }
    %c0_i32_1 = arith.constant 0 : i32
    %3 = arith.cmpi sgt, %arg0, %c0_i32_1 : i32
    %4 = arith.extui %3 : i1 to i32
    %c0_i32_2 = arith.constant 0 : i32
    %5 = arith.cmpi ne, %4, %c0_i32_2 : i32
    scf.if %5 {
      %c0_62 = arith.constant 0 : index
      %c0_63 = arith.constant 0 : index
      %223 = vector.load %arg7[%c0_62, %c0_63] : memref<8x128xf32, #tpu.memory_space<vmem>>, vector<8x32xf32>
      %224 = arith.truncf %223 : vector<8x32xf32> to vector<8x32xbf16>
      %c0_64 = arith.constant 0 : index
      %c0_65 = arith.constant 0 : index
      %c0_66 = arith.constant 0 : index
      %225 = vector.load %arg2[%c0_64, %c0_65, %c0_66] : memref<1x32x384xbf16, #tpu.memory_space<vmem>>, vector<1x32x384xbf16>
      %226 = vector.shape_cast %225 : vector<1x32x384xbf16> to vector<32x384xbf16>
      %cst_67 = arith.constant dense<0.000000e+00> : vector<8x384xf32>
      %227 = tpu.matmul %224, %226, %cst_67 {dimension_numbers = #tpu.dot_dimension_numbers<[1], [0], [0], [1], [0, 0, 1, 1], [], []>} : vector<8x32xbf16>, vector<32x384xbf16>, vector<8x384xf32> -> vector<8x384xf32>
      %c0_68 = arith.constant 0 : index
      %c0_69 = arith.constant 0 : index
      %c0_70 = arith.constant 0 : index
      %228 = vector.load %arg3[%c0_68, %c0_69, %c0_70] : memref<1x1x384xf32, #tpu.memory_space<vmem>>, vector<1x1x384xf32>
      %229 = vector.shape_cast %228 : vector<1x1x384xf32> to vector<1x384xf32>
      %230 = vector.broadcast %229 : vector<1x384xf32> to vector<8x384xf32>
      %231 = arith.addf %227, %230 : vector<8x384xf32>
      %c0_71 = arith.constant 0 : index
      %c0_72 = arith.constant 0 : index
      %232 = vector.load %arg9[%c0_71, %c0_72] : memref<8x384xf32, #tpu.memory_space<vmem>>, vector<8x384xf32>
      tpu.vector_store %arg9[%c0_71, %c0_72], %231 {strides = array<i32>} : memref<8x384xf32, #tpu.memory_space<vmem>>, vector<8x384xf32>,
    } else {
    }
    %c0 = arith.constant 0 : index
    %c0_3 = arith.constant 0 : index
    %c0_4 = arith.constant 0 : index
    %6 = vector.load %arg4[%c0, %c0_3, %c0_4] : memref<1x32x384xbf16, #tpu.memory_space<vmem>>, vector<1x32x384xbf16>
    %7 = vector.shape_cast %6 : vector<1x32x384xbf16> to vector<32x384xbf16>
    %c0_5 = arith.constant 0 : index
    %c0_6 = arith.constant 0 : index
    %c0_7 = arith.constant 0 : index
    %8 = vector.load %arg5[%c0_5, %c0_6, %c0_7] : memref<1x1x128xf32, #tpu.memory_space<vmem>>, vector<1x1x128xf32>
    %9 = vector.shape_cast %8 : vector<1x1x128xf32> to vector<1x128xf32>
    %c0_8 = arith.constant 0 : index
    %c0_9 = arith.constant 0 : index
    %c0_10 = arith.constant 0 : index
    %10 = vector.load %arg6[%c0_8, %c0_9, %c0_10] : memref<1x1x128xf32, #tpu.memory_space<vmem>>, vector<1x1x128xf32>
    %11 = vector.shape_cast %10 : vector<1x1x128xf32> to vector<1x128xf32>
    %c0_11 = arith.constant 0 : index
    %c0_12 = arith.constant 0 : index
    %12 = vector.load %arg9[%c0_11, %c0_12] : memref<8x384xf32, #tpu.memory_space<vmem>>, vector<1x384xf32>
    %13 = vector.extract_strided_slice %11 {offsets = [0, 0], sizes = [1, 32], strides = [1, 1]} : vector<1x128xf32> to vector<1x32xf32>
    %14 = arith.truncf %13 : vector<1x32xf32> to vector<1x32xbf16>
    %cst = arith.constant dense<0.000000e+00> : vector<1x384xf32>
    %15 = tpu.matmul %14, %7, %cst {dimension_numbers = #tpu.dot_dimension_numbers<[1], [0], [0], [1], [0, 0, 1, 1], [], []>} : vector<1x32xbf16>, vector<32x384xbf16>, vector<1x384xf32> -> vector<1x384xf32>
    %16 = vector.extract_strided_slice %12 {offsets = [0, 0], sizes = [1, 256], strides = [1, 1]} : vector<1x384xf32> to vector<1x256xf32>
    %17 = vector.extract_strided_slice %15 {offsets = [0, 0], sizes = [1, 256], strides = [1, 1]} : vector<1x384xf32> to vector<1x256xf32>
    %18 = arith.addf %16, %17 : vector<1x256xf32>
    %19 = arith.negf %18 : vector<1x256xf32>
    %20 = math.exp %19 : vector<1x256xf32>
    %cst_13 = arith.constant 1.000000e+00 : f32
    %21 = vector.broadcast %cst_13 : f32 to vector<1x256xf32>
    %22 = arith.addf %21, %20 : vector<1x256xf32>
    %23 = arith.divf %21, %22 : vector<1x256xf32>
    %24 = vector.extract_strided_slice %23 {offsets = [0, 0], sizes = [1, 128], strides = [1, 1]} : vector<1x256xf32> to vector<1x128xf32>
    %25 = vector.extract_strided_slice %23 {offsets = [0, 128], sizes = [1, 128], strides = [1, 1]} : vector<1x256xf32> to vector<1x128xf32>
    %26 = vector.extract_strided_slice %12 {offsets = [0, 256], sizes = [1, 128], strides = [1, 1]} : vector<1x384xf32> to vector<1x128xf32>
    %27 = vector.extract_strided_slice %15 {offsets = [0, 256], sizes = [1, 128], strides = [1, 1]} : vector<1x384xf32> to vector<1x128xf32>
    %28 = arith.addf %27, %9 : vector<1x128xf32>
    %29 = arith.mulf %24, %28 : vector<1x128xf32>
    %30 = arith.addf %26, %29 : vector<1x128xf32>
    %31 = math.tanh %30 : vector<1x128xf32>
    %cst_14 = arith.constant 1.000000e+00 : f32
    %32 = vector.broadcast %cst_14 : f32 to vector<1x128xf32>
    %33 = arith.subf %32, %25 : vector<1x128xf32>
    %34 = arith.mulf %33, %31 : vector<1x128xf32>
    %35 = arith.mulf %25, %11 : vector<1x128xf32>
    %36 = arith.addf %34, %35 : vector<1x128xf32>
    %c0_15 = arith.constant 0 : index
    %c0_16 = arith.constant 0 : index
    %37 = vector.load %arg7[%c0_15, %c0_16] : memref<8x128xf32, #tpu.memory_space<vmem>>, vector<1x128xf32>
    tpu.vector_store %arg7[%c0_15, %c0_16], %36 {strides = array<i32>} : memref<8x128xf32, #tpu.memory_space<vmem>>, vector<1x128xf32>,
    %c1 = arith.constant 1 : index
    %c0_17 = arith.constant 0 : index
    %38 = vector.load %arg9[%c1, %c0_17] : memref<8x384xf32, #tpu.memory_space<vmem>>, vector<1x384xf32>
    %39 = vector.extract_strided_slice %36 {offsets = [0, 0], sizes = [1, 32], strides = [1, 1]} : vector<1x128xf32> to vector<1x32xf32>
    %40 = arith.truncf %39 : vector<1x32xf32> to vector<1x32xbf16>
    %cst_18 = arith.constant dense<0.000000e+00> : vector<1x384xf32>
    %41 = tpu.matmul %40, %7, %cst_18 {dimension_numbers = #tpu.dot_dimension_numbers<[1], [0], [0], [1], [0, 0, 1, 1], [], []>} : vector<1x32xbf16>, vector<32x384xbf16>, vector<1x384xf32> -> vector<1x384xf32>
    %42 = vector.extract_strided_slice %38 {offsets = [0, 0], sizes = [1, 256], strides = [1, 1]} : vector<1x384xf32> to vector<1x256xf32>
    %43 = vector.extract_strided_slice %41 {offsets = [0, 0], sizes = [1, 256], strides = [1, 1]} : vector<1x384xf32> to vector<1x256xf32>
    %44 = arith.addf %42, %43 : vector<1x256xf32>
    %45 = arith.negf %44 : vector<1x256xf32>
    %46 = math.exp %45 : vector<1x256xf32>
    %cst_19 = arith.constant 1.000000e+00 : f32
    %47 = vector.broadcast %cst_19 : f32 to vector<1x256xf32>
    %48 = arith.addf %47, %46 : vector<1x256xf32>
    %49 = arith.divf %47, %48 : vector<1x256xf32>
    %50 = vector.extract_strided_slice %49 {offsets = [0, 0], sizes = [1, 128], strides = [1, 1]} : vector<1x256xf32> to vector<1x128xf32>
    %51 = vector.extract_strided_slice %49 {offsets = [0, 128], sizes = [1, 128], strides = [1, 1]} : vector<1x256xf32> to vector<1x128xf32>
    %52 = vector.extract_strided_slice %38 {offsets = [0, 256], sizes = [1, 128], strides = [1, 1]} : vector<1x384xf32> to vector<1x128xf32>
    %53 = vector.extract_strided_slice %41 {offsets = [0, 256], sizes = [1, 128], strides = [1, 1]} : vector<1x384xf32> to vector<1x128xf32>
    %54 = arith.addf %53, %9 : vector<1x128xf32>
    %55 = arith.mulf %50, %54 : vector<1x128xf32>
    %56 = arith.addf %52, %55 : vector<1x128xf32>
    %57 = math.tanh %56 : vector<1x128xf32>
    %cst_20 = arith.constant 1.000000e+00 : f32
    %58 = vector.broadcast %cst_20 : f32 to vector<1x128xf32>
    %59 = arith.subf %58, %51 : vector<1x128xf32>
    %60 = arith.mulf %59, %57 : vector<1x128xf32>
    %61 = arith.mulf %51, %36 : vector<1x128xf32>
    %62 = arith.addf %60, %61 : vector<1x128xf32>
    %c1_21 = arith.constant 1 : index
    %c0_22 = arith.constant 0 : index
    %63 = vector.load %arg7[%c1_21, %c0_22] : memref<8x128xf32, #tpu.memory_space<vmem>>, vector<1x128xf32>
    tpu.vector_store %arg7[%c1_21, %c0_22], %62 {strides = array<i32>} : memref<8x128xf32, #tpu.memory_space<vmem>>, vector<1x128xf32>,
    %c2 = arith.constant 2 : index
    %c0_23 = arith.constant 0 : index
    %64 = vector.load %arg9[%c2, %c0_23] : memref<8x384xf32, #tpu.memory_space<vmem>>, vector<1x384xf32>
    %65 = vector.extract_strided_slice %62 {offsets = [0, 0], sizes = [1, 32], strides = [1, 1]} : vector<1x128xf32> to vector<1x32xf32>
    %66 = arith.truncf %65 : vector<1x32xf32> to vector<1x32xbf16>
    %cst_24 = arith.constant dense<0.000000e+00> : vector<1x384xf32>
    %67 = tpu.matmul %66, %7, %cst_24 {dimension_numbers = #tpu.dot_dimension_numbers<[1], [0], [0], [1], [0, 0, 1, 1], [], []>} : vector<1x32xbf16>, vector<32x384xbf16>, vector<1x384xf32> -> vector<1x384xf32>
    %68 = vector.extract_strided_slice %64 {offsets = [0, 0], sizes = [1, 256], strides = [1, 1]} : vector<1x384xf32> to vector<1x256xf32>
    %69 = vector.extract_strided_slice %67 {offsets = [0, 0], sizes = [1, 256], strides = [1, 1]} : vector<1x384xf32> to vector<1x256xf32>
    %70 = arith.addf %68, %69 : vector<1x256xf32>
    %71 = arith.negf %70 : vector<1x256xf32>
    %72 = math.exp %71 : vector<1x256xf32>
    %cst_25 = arith.constant 1.000000e+00 : f32
    %73 = vector.broadcast %cst_25 : f32 to vector<1x256xf32>
    %74 = arith.addf %73, %72 : vector<1x256xf32>
    %75 = arith.divf %73, %74 : vector<1x256xf32>
    %76 = vector.extract_strided_slice %75 {offsets = [0, 0], sizes = [1, 128], strides = [1, 1]} : vector<1x256xf32> to vector<1x128xf32>
    %77 = vector.extract_strided_slice %75 {offsets = [0, 128], sizes = [1, 128], strides = [1, 1]} : vector<1x256xf32> to vector<1x128xf32>
    %78 = vector.extract_strided_slice %64 {offsets = [0, 256], sizes = [1, 128], strides = [1, 1]} : vector<1x384xf32> to vector<1x128xf32>
    %79 = vector.extract_strided_slice %67 {offsets = [0, 256], sizes = [1, 128], strides = [1, 1]} : vector<1x384xf32> to vector<1x128xf32>
    %80 = arith.addf %79, %9 : vector<1x128xf32>
    %81 = arith.mulf %76, %80 : vector<1x128xf32>
    %82 = arith.addf %78, %81 : vector<1x128xf32>
    %83 = math.tanh %82 : vector<1x128xf32>
    %cst_26 = arith.constant 1.000000e+00 : f32
    %84 = vector.broadcast %cst_26 : f32 to vector<1x128xf32>
    %85 = arith.subf %84, %77 : vector<1x128xf32>
    %86 = arith.mulf %85, %83 : vector<1x128xf32>
    %87 = arith.mulf %77, %62 : vector<1x128xf32>
    %88 = arith.addf %86, %87 : vector<1x128xf32>
    %c2_27 = arith.constant 2 : index
    %c0_28 = arith.constant 0 : index
    %89 = vector.load %arg7[%c2_27, %c0_28] : memref<8x128xf32, #tpu.memory_space<vmem>>, vector<1x128xf32>
    tpu.vector_store %arg7[%c2_27, %c0_28], %88 {strides = array<i32>} : memref<8x128xf32, #tpu.memory_space<vmem>>, vector<1x128xf32>,
    %c3 = arith.constant 3 : index
    %c0_29 = arith.constant 0 : index
    %90 = vector.load %arg9[%c3, %c0_29] : memref<8x384xf32, #tpu.memory_space<vmem>>, vector<1x384xf32>
    %91 = vector.extract_strided_slice %88 {offsets = [0, 0], sizes = [1, 32], strides = [1, 1]} : vector<1x128xf32> to vector<1x32xf32>
    %92 = arith.truncf %91 : vector<1x32xf32> to vector<1x32xbf16>
    %cst_30 = arith.constant dense<0.000000e+00> : vector<1x384xf32>
    %93 = tpu.matmul %92, %7, %cst_30 {dimension_numbers = #tpu.dot_dimension_numbers<[1], [0], [0], [1], [0, 0, 1, 1], [], []>} : vector<1x32xbf16>, vector<32x384xbf16>, vector<1x384xf32> -> vector<1x384xf32>
    %94 = vector.extract_strided_slice %90 {offsets = [0, 0], sizes = [1, 256], strides = [1, 1]} : vector<1x384xf32> to vector<1x256xf32>
    %95 = vector.extract_strided_slice %93 {offsets = [0, 0], sizes = [1, 256], strides = [1, 1]} : vector<1x384xf32> to vector<1x256xf32>
    %96 = arith.addf %94, %95 : vector<1x256xf32>
    %97 = arith.negf %96 : vector<1x256xf32>
    %98 = math.exp %97 : vector<1x256xf32>
    %cst_31 = arith.constant 1.000000e+00 : f32
    %99 = vector.broadcast %cst_31 : f32 to vector<1x256xf32>
    %100 = arith.addf %99, %98 : vector<1x256xf32>
    %101 = arith.divf %99, %100 : vector<1x256xf32>
    %102 = vector.extract_strided_slice %101 {offsets = [0, 0], sizes = [1, 128], strides = [1, 1]} : vector<1x256xf32> to vector<1x128xf32>
    %103 = vector.extract_strided_slice %101 {offsets = [0, 128], sizes = [1, 128], strides = [1, 1]} : vector<1x256xf32> to vector<1x128xf32>
    %104 = vector.extract_strided_slice %90 {offsets = [0, 256], sizes = [1, 128], strides = [1, 1]} : vector<1x384xf32> to vector<1x128xf32>
    %105 = vector.extract_strided_slice %93 {offsets = [0, 256], sizes = [1, 128], strides = [1, 1]} : vector<1x384xf32> to vector<1x128xf32>
    %106 = arith.addf %105, %9 : vector<1x128xf32>
    %107 = arith.mulf %102, %106 : vector<1x128xf32>
    %108 = arith.addf %104, %107 : vector<1x128xf32>
    %109 = math.tanh %108 : vector<1x128xf32>
    %cst_32 = arith.constant 1.000000e+00 : f32
    %110 = vector.broadcast %cst_32 : f32 to vector<1x128xf32>
    %111 = arith.subf %110, %103 : vector<1x128xf32>
    %112 = arith.mulf %111, %109 : vector<1x128xf32>
    %113 = arith.mulf %103, %88 : vector<1x128xf32>
    %114 = arith.addf %112, %113 : vector<1x128xf32>
    %c3_33 = arith.constant 3 : index
    %c0_34 = arith.constant 0 : index
    %115 = vector.load %arg7[%c3_33, %c0_34] : memref<8x128xf32, #tpu.memory_space<vmem>>, vector<1x128xf32>
    tpu.vector_store %arg7[%c3_33, %c0_34], %114 {strides = array<i32>} : memref<8x128xf32, #tpu.memory_space<vmem>>, vector<1x128xf32>,
    %c4 = arith.constant 4 : index
    %c0_35 = arith.constant 0 : index
    %116 = vector.load %arg9[%c4, %c0_35] : memref<8x384xf32, #tpu.memory_space<vmem>>, vector<1x384xf32>
    %117 = vector.extract_strided_slice %114 {offsets = [0, 0], sizes = [1, 32], strides = [1, 1]} : vector<1x128xf32> to vector<1x32xf32>
    %118 = arith.truncf %117 : vector<1x32xf32> to vector<1x32xbf16>
    %cst_36 = arith.constant dense<0.000000e+00> : vector<1x384xf32>
    %119 = tpu.matmul %118, %7, %cst_36 {dimension_numbers = #tpu.dot_dimension_numbers<[1], [0], [0], [1], [0, 0, 1, 1], [], []>} : vector<1x32xbf16>, vector<32x384xbf16>, vector<1x384xf32> -> vector<1x384xf32>
    %120 = vector.extract_strided_slice %116 {offsets = [0, 0], sizes = [1, 256], strides = [1, 1]} : vector<1x384xf32> to vector<1x256xf32>
    %121 = vector.extract_strided_slice %119 {offsets = [0, 0], sizes = [1, 256], strides = [1, 1]} : vector<1x384xf32> to vector<1x256xf32>
    %122 = arith.addf %120, %121 : vector<1x256xf32>
    %123 = arith.negf %122 : vector<1x256xf32>
    %124 = math.exp %123 : vector<1x256xf32>
    %cst_37 = arith.constant 1.000000e+00 : f32
    %125 = vector.broadcast %cst_37 : f32 to vector<1x256xf32>
    %126 = arith.addf %125, %124 : vector<1x256xf32>
    %127 = arith.divf %125, %126 : vector<1x256xf32>
    %128 = vector.extract_strided_slice %127 {offsets = [0, 0], sizes = [1, 128], strides = [1, 1]} : vector<1x256xf32> to vector<1x128xf32>
    %129 = vector.extract_strided_slice %127 {offsets = [0, 128], sizes = [1, 128], strides = [1, 1]} : vector<1x256xf32> to vector<1x128xf32>
    %130 = vector.extract_strided_slice %116 {offsets = [0, 256], sizes = [1, 128], strides = [1, 1]} : vector<1x384xf32> to vector<1x128xf32>
    %131 = vector.extract_strided_slice %119 {offsets = [0, 256], sizes = [1, 128], strides = [1, 1]} : vector<1x384xf32> to vector<1x128xf32>
    %132 = arith.addf %131, %9 : vector<1x128xf32>
    %133 = arith.mulf %128, %132 : vector<1x128xf32>
    %134 = arith.addf %130, %133 : vector<1x128xf32>
    %135 = math.tanh %134 : vector<1x128xf32>
    %cst_38 = arith.constant 1.000000e+00 : f32
    %136 = vector.broadcast %cst_38 : f32 to vector<1x128xf32>
    %137 = arith.subf %136, %129 : vector<1x128xf32>
    %138 = arith.mulf %137, %135 : vector<1x128xf32>
    %139 = arith.mulf %129, %114 : vector<1x128xf32>
    %140 = arith.addf %138, %139 : vector<1x128xf32>
    %c4_39 = arith.constant 4 : index
    %c0_40 = arith.constant 0 : index
    %141 = vector.load %arg7[%c4_39, %c0_40] : memref<8x128xf32, #tpu.memory_space<vmem>>, vector<1x128xf32>
    tpu.vector_store %arg7[%c4_39, %c0_40], %140 {strides = array<i32>} : memref<8x128xf32, #tpu.memory_space<vmem>>, vector<1x128xf32>,
    %c5 = arith.constant 5 : index
    %c0_41 = arith.constant 0 : index
    %142 = vector.load %arg9[%c5, %c0_41] : memref<8x384xf32, #tpu.memory_space<vmem>>, vector<1x384xf32>
    %143 = vector.extract_strided_slice %140 {offsets = [0, 0], sizes = [1, 32], strides = [1, 1]} : vector<1x128xf32> to vector<1x32xf32>
    %144 = arith.truncf %143 : vector<1x32xf32> to vector<1x32xbf16>
    %cst_42 = arith.constant dense<0.000000e+00> : vector<1x384xf32>
    %145 = tpu.matmul %144, %7, %cst_42 {dimension_numbers = #tpu.dot_dimension_numbers<[1], [0], [0], [1], [0, 0, 1, 1], [], []>} : vector<1x32xbf16>, vector<32x384xbf16>, vector<1x384xf32> -> vector<1x384xf32>
    %146 = vector.extract_strided_slice %142 {offsets = [0, 0], sizes = [1, 256], strides = [1, 1]} : vector<1x384xf32> to vector<1x256xf32>
    %147 = vector.extract_strided_slice %145 {offsets = [0, 0], sizes = [1, 256], strides = [1, 1]} : vector<1x384xf32> to vector<1x256xf32>
    %148 = arith.addf %146, %147 : vector<1x256xf32>
    %149 = arith.negf %148 : vector<1x256xf32>
    %150 = math.exp %149 : vector<1x256xf32>
    %cst_43 = arith.constant 1.000000e+00 : f32
    %151 = vector.broadcast %cst_43 : f32 to vector<1x256xf32>
    %152 = arith.addf %151, %150 : vector<1x256xf32>
    %153 = arith.divf %151, %152 : vector<1x256xf32>
    %154 = vector.extract_strided_slice %153 {offsets = [0, 0], sizes = [1, 128], strides = [1, 1]} : vector<1x256xf32> to vector<1x128xf32>
    %155 = vector.extract_strided_slice %153 {offsets = [0, 128], sizes = [1, 128], strides = [1, 1]} : vector<1x256xf32> to vector<1x128xf32>
    %156 = vector.extract_strided_slice %142 {offsets = [0, 256], sizes = [1, 128], strides = [1, 1]} : vector<1x384xf32> to vector<1x128xf32>
    %157 = vector.extract_strided_slice %145 {offsets = [0, 256], sizes = [1, 128], strides = [1, 1]} : vector<1x384xf32> to vector<1x128xf32>
    %158 = arith.addf %157, %9 : vector<1x128xf32>
    %159 = arith.mulf %154, %158 : vector<1x128xf32>
    %160 = arith.addf %156, %159 : vector<1x128xf32>
    %161 = math.tanh %160 : vector<1x128xf32>
    %cst_44 = arith.constant 1.000000e+00 : f32
    %162 = vector.broadcast %cst_44 : f32 to vector<1x128xf32>
    %163 = arith.subf %162, %155 : vector<1x128xf32>
    %164 = arith.mulf %163, %161 : vector<1x128xf32>
    %165 = arith.mulf %155, %140 : vector<1x128xf32>
    %166 = arith.addf %164, %165 : vector<1x128xf32>
    %c5_45 = arith.constant 5 : index
    %c0_46 = arith.constant 0 : index
    %167 = vector.load %arg7[%c5_45, %c0_46] : memref<8x128xf32, #tpu.memory_space<vmem>>, vector<1x128xf32>
    tpu.vector_store %arg7[%c5_45, %c0_46], %166 {strides = array<i32>} : memref<8x128xf32, #tpu.memory_space<vmem>>, vector<1x128xf32>,
    %c6 = arith.constant 6 : index
    %c0_47 = arith.constant 0 : index
    %168 = vector.load %arg9[%c6, %c0_47] : memref<8x384xf32, #tpu.memory_space<vmem>>, vector<1x384xf32>
    %169 = vector.extract_strided_slice %166 {offsets = [0, 0], sizes = [1, 32], strides = [1, 1]} : vector<1x128xf32> to vector<1x32xf32>
    %170 = arith.truncf %169 : vector<1x32xf32> to vector<1x32xbf16>
    %cst_48 = arith.constant dense<0.000000e+00> : vector<1x384xf32>
    %171 = tpu.matmul %170, %7, %cst_48 {dimension_numbers = #tpu.dot_dimension_numbers<[1], [0], [0], [1], [0, 0, 1, 1], [], []>} : vector<1x32xbf16>, vector<32x384xbf16>, vector<1x384xf32> -> vector<1x384xf32>
    %172 = vector.extract_strided_slice %168 {offsets = [0, 0], sizes = [1, 256], strides = [1, 1]} : vector<1x384xf32> to vector<1x256xf32>
    %173 = vector.extract_strided_slice %171 {offsets = [0, 0], sizes = [1, 256], strides = [1, 1]} : vector<1x384xf32> to vector<1x256xf32>
    %174 = arith.addf %172, %173 : vector<1x256xf32>
    %175 = arith.negf %174 : vector<1x256xf32>
    %176 = math.exp %175 : vector<1x256xf32>
    %cst_49 = arith.constant 1.000000e+00 : f32
    %177 = vector.broadcast %cst_49 : f32 to vector<1x256xf32>
    %178 = arith.addf %177, %176 : vector<1x256xf32>
    %179 = arith.divf %177, %178 : vector<1x256xf32>
    %180 = vector.extract_strided_slice %179 {offsets = [0, 0], sizes = [1, 128], strides = [1, 1]} : vector<1x256xf32> to vector<1x128xf32>
    %181 = vector.extract_strided_slice %179 {offsets = [0, 128], sizes = [1, 128], strides = [1, 1]} : vector<1x256xf32> to vector<1x128xf32>
    %182 = vector.extract_strided_slice %168 {offsets = [0, 256], sizes = [1, 128], strides = [1, 1]} : vector<1x384xf32> to vector<1x128xf32>
    %183 = vector.extract_strided_slice %171 {offsets = [0, 256], sizes = [1, 128], strides = [1, 1]} : vector<1x384xf32> to vector<1x128xf32>
    %184 = arith.addf %183, %9 : vector<1x128xf32>
    %185 = arith.mulf %180, %184 : vector<1x128xf32>
    %186 = arith.addf %182, %185 : vector<1x128xf32>
    %187 = math.tanh %186 : vector<1x128xf32>
    %cst_50 = arith.constant 1.000000e+00 : f32
    %188 = vector.broadcast %cst_50 : f32 to vector<1x128xf32>
    %189 = arith.subf %188, %181 : vector<1x128xf32>
    %190 = arith.mulf %189, %187 : vector<1x128xf32>
    %191 = arith.mulf %181, %166 : vector<1x128xf32>
    %192 = arith.addf %190, %191 : vector<1x128xf32>
    %c6_51 = arith.constant 6 : index
    %c0_52 = arith.constant 0 : index
    %193 = vector.load %arg7[%c6_51, %c0_52] : memref<8x128xf32, #tpu.memory_space<vmem>>, vector<1x128xf32>
    tpu.vector_store %arg7[%c6_51, %c0_52], %192 {strides = array<i32>} : memref<8x128xf32, #tpu.memory_space<vmem>>, vector<1x128xf32>,
    %c7 = arith.constant 7 : index
    %c0_53 = arith.constant 0 : index
    %194 = vector.load %arg9[%c7, %c0_53] : memref<8x384xf32, #tpu.memory_space<vmem>>, vector<1x384xf32>
    %195 = vector.extract_strided_slice %192 {offsets = [0, 0], sizes = [1, 32], strides = [1, 1]} : vector<1x128xf32> to vector<1x32xf32>
    %196 = arith.truncf %195 : vector<1x32xf32> to vector<1x32xbf16>
    %cst_54 = arith.constant dense<0.000000e+00> : vector<1x384xf32>
    %197 = tpu.matmul %196, %7, %cst_54 {dimension_numbers = #tpu.dot_dimension_numbers<[1], [0], [0], [1], [0, 0, 1, 1], [], []>} : vector<1x32xbf16>, vector<32x384xbf16>, vector<1x384xf32> -> vector<1x384xf32>
    %198 = vector.extract_strided_slice %194 {offsets = [0, 0], sizes = [1, 256], strides = [1, 1]} : vector<1x384xf32> to vector<1x256xf32>
    %199 = vector.extract_strided_slice %197 {offsets = [0, 0], sizes = [1, 256], strides = [1, 1]} : vector<1x384xf32> to vector<1x256xf32>
    %200 = arith.addf %198, %199 : vector<1x256xf32>
    %201 = arith.negf %200 : vector<1x256xf32>
    %202 = math.exp %201 : vector<1x256xf32>
    %cst_55 = arith.constant 1.000000e+00 : f32
    %203 = vector.broadcast %cst_55 : f32 to vector<1x256xf32>
    %204 = arith.addf %203, %202 : vector<1x256xf32>
    %205 = arith.divf %203, %204 : vector<1x256xf32>
    %206 = vector.extract_strided_slice %205 {offsets = [0, 0], sizes = [1, 128], strides = [1, 1]} : vector<1x256xf32> to vector<1x128xf32>
    %207 = vector.extract_strided_slice %205 {offsets = [0, 128], sizes = [1, 128], strides = [1, 1]} : vector<1x256xf32> to vector<1x128xf32>
    %208 = vector.extract_strided_slice %194 {offsets = [0, 256], sizes = [1, 128], strides = [1, 1]} : vector<1x384xf32> to vector<1x128xf32>
    %209 = vector.extract_strided_slice %197 {offsets = [0, 256], sizes = [1, 128], strides = [1, 1]} : vector<1x384xf32> to vector<1x128xf32>
    %210 = arith.addf %209, %9 : vector<1x128xf32>
    %211 = arith.mulf %206, %210 : vector<1x128xf32>
    %212 = arith.addf %208, %211 : vector<1x128xf32>
    %213 = math.tanh %212 : vector<1x128xf32>
    %cst_56 = arith.constant 1.000000e+00 : f32
    %214 = vector.broadcast %cst_56 : f32 to vector<1x128xf32>
    %215 = arith.subf %214, %207 : vector<1x128xf32>
    %216 = arith.mulf %215, %213 : vector<1x128xf32>
    %217 = arith.mulf %207, %192 : vector<1x128xf32>
    %218 = arith.addf %216, %217 : vector<1x128xf32>
    %c7_57 = arith.constant 7 : index
    %c0_58 = arith.constant 0 : index
    %219 = vector.load %arg7[%c7_57, %c0_58] : memref<8x128xf32, #tpu.memory_space<vmem>>, vector<1x128xf32>
    tpu.vector_store %arg7[%c7_57, %c0_58], %218 {strides = array<i32>} : memref<8x128xf32, #tpu.memory_space<vmem>>, vector<1x128xf32>,
    %c0_59 = arith.constant 0 : index
    %c0_60 = arith.constant 0 : index
    %c0_61 = arith.constant 0 : index
    %220 = vector.load %arg8[%c0_59, %c0_60, %c0_61] : memref<1x1x128xf32, #tpu.memory_space<vmem>>, vector<1x1x128xf32>
    %221 = vector.shape_cast %220 : vector<1x1x128xf32> to vector<1x128xf32>
    %222 = vector.shape_cast %218 : vector<1x128xf32> to vector<1x1x128xf32>
    tpu.vector_store %arg8[%c0_59, %c0_60, %c0_61], %222 {strides = array<i32>} : memref<1x1x128xf32, #tpu.memory_space<vmem>>, vector<1x1x128xf32>,
    return
  }
  func.func @transform_0(%arg0: i32) -> (i32, i32) {
    %c0_i32 = arith.constant 0 : i32
    %c0_i32_0 = arith.constant 0 : i32
    %c0_i32_1 = arith.constant 0 : i32
    return %c0_i32, %c0_i32_0 : i32, i32
  }
  func.func @transform_1(%arg0: i32) -> (i32, i32, i32) {
    %c0_i32 = arith.constant 0 : i32
    %c0_i32_0 = arith.constant 0 : i32
    %c0_i32_1 = arith.constant 0 : i32
    return %arg0, %c0_i32, %c0_i32_0 : i32, i32, i32
  }
  func.func @transform_2(%arg0: i32) -> (i32, i32, i32) {
    %c0_i32 = arith.constant 0 : i32
    %c0_i32_0 = arith.constant 0 : i32
    %c0_i32_1 = arith.constant 0 : i32
    return %arg0, %c0_i32, %c0_i32_0 : i32, i32, i32
  }
  func.func @transform_3(%arg0: i32) -> (i32, i32, i32) {
    %c0_i32 = arith.constant 0 : i32
    %c0_i32_0 = arith.constant 0 : i32
    %c0_i32_1 = arith.constant 0 : i32
    return %arg0, %c0_i32, %c0_i32_0 : i32, i32, i32
  }
  func.func @transform_4(%arg0: i32) -> (i32, i32, i32) {
    %c0_i32 = arith.constant 0 : i32
    %c0_i32_0 = arith.constant 0 : i32
    %c0_i32_1 = arith.constant 0 : i32
    return %arg0, %c0_i32, %c0_i32_0 : i32, i32, i32
  }
  func.func @transform_5(%arg0: i32) -> (i32, i32, i32) {
    %c0_i32 = arith.constant 0 : i32
    %c0_i32_0 = arith.constant 0 : i32
    %c0_i32_1 = arith.constant 0 : i32
    return %arg0, %c0_i32, %c0_i32_0 : i32, i32, i32
  }
  func.func @transform_6(%arg0: i32) -> (i32, i32) {
    %c0_i32 = arith.constant 0 : i32
    %c0_i32_0 = arith.constant 0 : i32
    %c0_i32_1 = arith.constant 0 : i32
    return %c0_i32, %c0_i32_0 : i32, i32
  }
  func.func @transform_7(%arg0: i32) -> (i32, i32, i32) {
    %c0_i32 = arith.constant 0 : i32
    %c0_i32_0 = arith.constant 0 : i32
    %c0_i32_1 = arith.constant 0 : i32
    return %arg0, %c0_i32, %c0_i32_0 : i32, i32, i32
  }
}

</mosaic_0001>

<bundles_post_ra>
// kernel: encoder_rnn_forward.1
= control target key start
LH: loop header
LB: loop body
LE: loop exit
PB: predicated region body
PF: predicated region fallthrough
CT: control target
= control target key end

     0   :  { %13 = vsyncpa [#allocation4], 0  ;;  %s1514_s0 = inlined_call_operand.vmem [shape: bf16[8,32], index: 0, kind: input, shape index: {}]   ;;  %s1515_s1 = inlined_call_operand.vmem [shape: bf16[1,32,384], index: 1, kind: input, shape index: {}]   ;;  %s1516_s2 = inlined_call_operand.hbm [shape: f32[1,1,384], index: 2, kind: input, shape index: {}]   ;;  %s1517_s3 = inlined_call_operand.hbm [shape: bf16[1,32,384], index: 3, kind: input, shape index: {}]   ;;  %s1518_s4 = inlined_call_operand.vmem [shape: f32[1,1,128], index: 4, kind: input, shape index: {}]   ;;  %s1519_s5 = inlined_call_operand.vmem [shape: f32[1,1,128], index: 5, kind: input, shape index: {}]   ;;  %s1520_s6 = inlined_call_operand.hbm [shape: f32[8,128], index: 6, kind: output, shape index: {0}]   ;;  %s1521_s7 = inlined_call_operand.hbm [shape: f32[1,1,128], index: 7, kind: output, shape index: {1}]  }
   0x1   :  { %14 = vsyncpa [#allocation7], 0 }
   0x2   :  { %15 = vsyncpa [#allocation5], 0 }
   0x3   :  { %16 = vsyncpa [#allocation10], 0  ;;  %s26_s26 = sshll.u32 %s1516_s2, 4  ;;  %s1301_s27 = smov [#allocation3]   ;;  %s27_s26 = int_to_ptr.hbm [resolvable:$true] %s26_s26 }
   0x4   :  { %s28_s28 = sshll.u32 %s1301_s27, 4  ;;  %s36_s8 = sshll.u32 %s1517_s3, 4  ;;  %s29_s28 = int_to_ptr.vmem [resolvable:$true] %s28_s28  ;;  %s37_s8 = int_to_ptr.hbm [resolvable:$true] %s36_s8 }
   0x5   :  { %31 = dma.hbm_to_vmem [thread:$0]  %s27_s26, 48, %s29_s28, [#allocation4]  }
   0x6   :  { %s1302_s9 = smov [#allocation6]   ;;  %s1303_s11 = smov 192  }
   0x7   :  { %s38_s10 = sshll.u32 %s1302_s9, 4  ;;  %s1304_s12 = smov 12   ;;  %s39_s10 = int_to_ptr.vmem [resolvable:$true] %s38_s10 }
   0x8   :  { %44 = dma.hbm_to_vmem [thread:$0]  %s37_s8, 768, %s39_s10, [#allocation7], %s1303_s11, %s1303_s11, %s1304_s12  }
   0x9   :  { %1293 = dma.done.wait [#allocation4], 48  }
   0xa   :  { %1294 = vsyncadd [#allocation4], 4294967248 }
   0xb   :  { %1295 = dma.done.wait [#allocation7], 768  }
   0xc   :  { %1296 = vsyncadd [#allocation7], 4294966528  ;;  %v1029_v0 = vld [vmem:[%s1515_s1 + $0x18] sm:$0xf]  ;;  %v1129_v1 = vld [vmem:[%s1515_s1 + $0x20] sm:$0xf0] }
   0xd   :  { %v1037_v2 = vld [vmem:[%s1515_s1 + $0x20] sm:$0xf]  ;;  %v1030_v3 = vor.u32 %v1129_v1, %v1029_v0  ;;  %v1130_v4 = vld [vmem:[%s1515_s1 + $0x28] sm:$0xf0]  ;;  %v1128_v5 = vld [vmem:[%s1515_s1 + $0x1c] sm:$0xf] }
   0xe   :  { %v1031_v6 = vld [vmem:[%s1515_s1 + $0x24] sm:$0xf0]  ;;  %v1038_v7 = vor.u32 %v1130_v4, %v1037_v2  ;;  %v1017_v9 = vld [vmem:[%s1515_s1] sm:$0xf]  ;;  %v1126_v10 = vld [vmem:[%s1515_s1 + $0x8] sm:$0xf0] }
   0xf   :  { %v1034_v8 = vor.u32 %v1128_v5, %v1031_v6  ;;  %v1025_v11 = vld [vmem:[%s1515_s1 + $0x8] sm:$0xf]  ;;  %121 = vmatpush.bf16.msra.mxu0 %v1030_v3  ;;  %v1018_v12 = vor.u32 %v1126_v10, %v1017_v9  ;;  %v1127_v13 = vld [vmem:[%s1515_s1 + $0x10] sm:$0xf0]  ;;  %v1141_v15 = vld [vmem:[#allocation6 + $0x20] sm:$0xf0] }
  0x10   :  { %v1083_v14 = vld [vmem:[#allocation6 + $0x18] sm:$0xf]  ;;  %147 = vmatpush.bf16.msra.mxu2 %v1038_v7  ;;  %v1026_v16 = vor.u32 %v1127_v13, %v1025_v11  ;;  %v1125_v18 = vld [vmem:[%s1515_s1 + $0x4] sm:$0xf]  ;;  %v1019_v19 = vld [vmem:[%s1515_s1 + $0xc] sm:$0xf0] }
  0x11   :  { %134 = vmatpush.bf16.msra.mxu1 %v1034_v8  ;;  %v1383_v17 = vor.u32 %v1141_v15, %v1083_v14  ;;  %vm111_vm0 = vcmask 261120   ;;  %v1022_v20 = vor.u32 %v1125_v18, %v1019_v19  ;;  %v62_v21 = vld [vmem:[%s1514_s0] sm:$0xf]  ;;  %v1140_v22 = vld [vmem:[#allocation6 + $0x1c] sm:$0xf]  ;;  %vm347_vm1 = vcmask 1040384  }
  0x12   :  { %v1085_v23 = vld [vmem:[#allocation6 + $0x24] sm:$0xf0]  ;;  %v1071_v24 = vld [vmem:[#allocation6] sm:$0xf]  ;;  %v1138_v26 = vld [vmem:[#allocation6 + $0x8] sm:$0xf0] }
  0x13   :  { %311 = vmatpush.bf16.msra.mxu3 %v1383_v17  ;;  %v1395_v25 = vor.u32 %v1140_v22, %v1085_v23  ;;  %v1400_v27 = vld [vmem:[%s1519_s5] sm:$0x1]  ;;  %122 = vmatpush.bf16.msra.mxu0 %v1018_v12  ;;  %v1402_v29 = vor.u32 %v1138_v26, %v1071_v24  ;;  %v1073_v30 = vld [vmem:[#allocation6 + $0xc] sm:$0xf0]  ;;  %v1091_v31 = vld [vmem:[#allocation6 + $0x20] sm:$0xf] }
  0x14   :  { %v1137_v28 = vld [vmem:[#allocation6 + $0x4] sm:$0xf]  ;;  %v1142_v32 = vld [vmem:[#allocation6 + $0x28] sm:$0xf0]  ;;  %148 = vmatpush.bf16.msra.mxu2 %v1026_v16  ;;  %v268_v34 = vpack.c.bf16 %v1400_v27, %v1400_v27  ;;  %v1079_v36 = vld [vmem:[#allocation6 + $0x8] sm:$0xf] }
  0x15   :  { %135 = vmatpush.bf16.msra.mxu1 %v1022_v20  ;;  %v1404_v33 = vor.u32 %v1142_v32, %v1091_v31  ;;  %v1409_v35 = vor.u32 %v1137_v28, %v1073_v30  ;;  %v1139_v37 = vld [vmem:[#allocation6 + $0x10] sm:$0xf0]  ;;  %v71_v39 = vld [vmem:[#allocation3] sm:$0x7]  ;;  %v1443_v4 = vld [vmem:[%s1518_s4] sm:$0x1] }
  0x16   :  { %1039 = vmatmul.msk.bf16.vlgmr.msra.gmra.mxu0 %vm111_vm0, %v62_v21  ;;  %v1417_v38 = vor.u32 %v1139_v37, %v1079_v36  ;;  %v73_v40 = vperm.slane %v71_v39, 0  ;;  %v74_v41 = vperm.slane %v71_v39, 1  ;;  %v75_v46 = vperm.slane %v71_v39, 2  ;;  %s1305_s4 = smov [#allocation8]   ;;  %s988_s16 = sshll.u32 %s1520_s6, 4  ;;  %s989_s16 = int_to_ptr.hbm [resolvable:$true] %s988_s16 }
  0x17   :  { %324 = vmatpush.bf16.msrb.mxu0 %v1395_v25  ;;  %312 = vmatpush.bf16.msra.mxu3 %v1402_v29  ;;  %s986_s5 = sshll.u32 %s1305_s4, 4  ;;  %s1306_s17 = smov [#allocation9]   ;;  %s987_s5 = int_to_ptr.vmem [resolvable:$true] %s986_s5 }
  0x18   :  { %397 = vmatpush.bf16.msrb.mxu2 %v1383_v17  ;;  %1040 = vmatmul.msk.bf16.vlgmr.msra.gmra.mxu1 %vm111_vm0, %v62_v21  ;;  %s997_s18 = sshll.u32 %s1306_s17, 4  ;;  %s999_s21 = sshll.u32 %s1521_s7, 4  ;;  %s998_s18 = int_to_ptr.vmem [resolvable:$true] %s997_s18  ;;  %s1000_s21 = int_to_ptr.hbm [resolvable:$true] %s999_s21 }
  0x19   :  { %1041 = vmatmul.msk.bf16.vlgmr.msra.gmra.mxu2 %vm111_vm0, %v62_v21  ;;  %337 = vmatpush.bf16.msrb.mxu1 %v1404_v33 }
  0x1a   :  { %1093 = vmatmul.msk.bf16.vlgmr.msra.gmra.mxu3 %vm111_vm0, %v268_v34 }
  0x1b   :  { %410 = vmatpush.bf16.msrb.mxu3 %v1395_v25  ;;  %325 = vmatpush.bf16.msrb.mxu0 %v1409_v35 }
  0x1c   :  { %398 = vmatpush.bf16.msrb.mxu2 %v1402_v29 }
  0x1d   :  { %338 = vmatpush.bf16.msrb.mxu1 %v1417_v38 }
  0x1f   :  { %423 = vmatpush.bf16.msra.mxu0 %v1404_v33  ;;  %411 = vmatpush.bf16.msrb.mxu3 %v1409_v35 }
  0x20   :  { %495 = vmatpush.bf16.msra.mxu2 %v1395_v25 }
  0x21   :  { %482 = vmatpush.bf16.msra.mxu1 %v1383_v17 }
  0x23   :  { %508 = vmatpush.bf16.msra.mxu3 %v1404_v33  ;;  %424 = vmatpush.bf16.msra.mxu0 %v1417_v38 }
  0x24   :  { %496 = vmatpush.bf16.msra.mxu2 %v1409_v35 }
  0x25   :  { %483 = vmatpush.bf16.msra.mxu1 %v1402_v29 }
  0x26   :  { %1094 = vmatmul.msk.bf16.vlgmr.msrb.gmra.mxu0 %vm111_vm0, %v268_v34 }
  0x27   :  { %509 = vmatpush.bf16.msra.mxu3 %v1417_v38  ;;  %567 = vmatpush.bf16.msrb.mxu0 %v1383_v17 }
  0x28   :  { %1095 = vmatmul.msk.bf16.vlgmr.msrb.gmra.mxu1 %vm111_vm0, %v268_v34 }
  0x29   :  { %580 = vmatpush.bf16.msrb.mxu1 %v1395_v25 }
  0x2b   :  { %568 = vmatpush.bf16.msrb.mxu0 %v1402_v29 }
  0x2d   :  { %581 = vmatpush.bf16.msrb.mxu1 %v1409_v35 }
  0x93   :  { %v124_v42 = vpop.f32.mrf.mxu0 }
  0x94   :  { %v125_v43 = vadd.f32 %v124_v42, %v73_v40 }
  0x95   :  { %v137_v44 = vpop.f32.mrf.mxu1 }
  0x96   :  { %v138_v45 = vadd.f32 %v137_v44, %v74_v41  ;;  %154 = vst [vmem:[#allocation2] sm:$0xff] %v125_v43 }
  0x98   :  { %155 = vst [vmem:[#allocation2 + $0x8] sm:$0xff] %v138_v45 }
  0x9b   :  { %v126_v49 = vpop.f32.mrf.mxu0 }
  0x9c   :  { %v150_v47 = vpop.f32.mrf.mxu2 }
  0x9d   :  { %v151_v48 = vadd.f32 %v150_v47, %v75_v46  ;;  %v139_v50 = vpop.f32.mrf.mxu1  ;;  %v314_v51 = vpop.f32.mrf.mxu3 }
  0x9f   :  { %156 = vst [vmem:[#allocation2 + $0x10] sm:$0xff] %v151_v48 }
  0xa3   :  { %v327_v53 = vpop.f32.mrf.mxu0 }
  0xa4   :  { %v152_v52 = vpop.f32.mrf.mxu2  ;;  %v346_v54 = vrot.slane %v327_v53, 7 }
  0xa5   :  { %v316_v55 = vpop.f32.mrf.mxu3  ;;  %v340_v56 = vpop.f32.mrf.mxu1 }
  0xa6   :  { %v267_v57 = vld [vmem:[#allocation2] ss:$8 sm:$0x7]  ;;  %v348_v58 = vsel %vm347_vm1, %v314_v51, %v346_v54  ;;  %v370_v9 = vadd.f32 %v340_v56, %v1443_v4  ;;  %v386_v30 = vld [vmem:[#allocation2 + $0x1] ss:$8 sm:$0x7] }
  0xa7   :  { %v350_v59 = vadd.f32 %v348_v58, %v267_v57  ;;  %v373_v14 = vrot.slane %v267_v57, 2  ;;  %v458_v54 = vrot.slane %v386_v30, 2 }
  0xa9   :  { %v1096_v60 = vmul.f32 -1.442695, %v350_v59 }
  0xab   :  { %1149 = vpow2.f32 %v1096_v60  ;;  %v329_v61 = vpop.f32.mrf.mxu0 }
  0xad   :  { %v342_v62 = vpop.f32.mrf.mxu1 }
  0xb1   :  { %v1150_v63 = vpop.eup %1149 }
  0xb2   :  { %v354_v0 = vadd.f32 1.0, %v1150_v63 }
  0xb4   :  { %1151 = vrcp.f32 %v354_v0  ;;  %v366_v5 = vand.u32 2147483648, %v354_v0  ;;  %v364_v7 = vand.u32 2147483647, %v354_v0  ;;  %vm360_vm3 = vweird.f32 %v354_v0 }
  0xb6   :  { %v367_v10 = vor.u32 1.1754944e-38, %v366_v5  ;;  %vm365_vm5 = vcmp.eq.f32.partialorder %v364_v7, 8.507059e+37  ;;  %v471_v5 = vld [vmem:[#allocation2 + $0x2] ss:$8 sm:$0x7] }
  0xba   :  { %v1152_v1 = vpop.eup %1151 }
  0xbb   :  { %v356_v2 = vmul.f32 %v1152_v1, %v354_v0  ;;  %vm361_vm2 = vweird.f32 %v1152_v1 }
  0xbc   :  { %vm362_vm4 = vmor %vm360_vm3, %vm361_vm2 }
  0xbd   :  { %v357_v3 = vsub.f32 1.0, %v356_v2 }
  0xbf   :  { %v358_v6 = vmul.f32 %v1152_v1, %v357_v3 }
  0xc1   :  { %v359_v8 = vadd.f32 %v1152_v1, %v358_v6 }
  0xc3   :  { %v363_v11 = vsel %vm362_vm4, %v1152_v1, %v359_v8 }
  0xc4   :  { %v368_v12 = vsel %vm365_vm5, %v367_v10, %v363_v11 }
  0xc5   :  { %v371_v13 = vmul.f32 %v370_v9, %v368_v12  ;;  %v378_v16 = vrot.slane %v368_v12, 1 }
  0xc7   :  { %v375_v15 = vadd.f32 %v373_v14, %v371_v13  ;;  %v380_v18 = vsub.f32 1.0, %v378_v16  ;;  %v382_v21 = vmul.f32 %v378_v16, %v1400_v27 }
  0xc9   :  { %1153 = vtanh.f32 %v375_v15 }
  0xcf   :  { %v1154_v19 = vpop.eup %1153 }
  0xd0   :  { %v381_v20 = vmul.f32 %v1154_v19, %v380_v18 }
  0xd2   :  { %v383_v22 = vadd.f32 %v382_v21, %v381_v20 }
  0xd4   :  { %384 = vst [vmem:[#allocation8] sm:$0x1] %v383_v22  ;;  %v387_v23 = vpack.c.bf16 %v383_v22, %v383_v22 }
  0xd6   :  { %1097 = vmatmul.msk.bf16.vlgmr.msrb.gmra.mxu2 %vm111_vm0, %v387_v23  ;;  %1098 = vmatmul.msk.bf16.vlgmr.msrb.gmra.mxu3 %vm111_vm0, %v387_v23 }
  0xd7   :  { %1099 = vmatmul.msk.bf16.vlgmr.msra.gmra.mxu0 %vm111_vm0, %v387_v23  ;;  %593 = vmatpush.bf16.msrb.mxu2 %v1404_v33 }
  0xd8   :  { %652 = vmatpush.bf16.msrb.mxu3 %v1383_v17  ;;  %665 = vmatpush.bf16.msra.mxu0 %v1395_v25 }
  0xdb   :  { %594 = vmatpush.bf16.msrb.mxu2 %v1417_v38 }
  0xdc   :  { %653 = vmatpush.bf16.msrb.mxu3 %v1402_v29  ;;  %666 = vmatpush.bf16.msra.mxu0 %v1409_v35 }
 0x154   :  { %v426_v24 = vpop.f32.mrf.mxu0 }
 0x155   :  { %v455_v50 = vadd.f32 %v426_v24, %v1443_v4 }
 0x159   :  { %v400_v26 = vpop.f32.mrf.mxu2  ;;  %v413_v27 = vpop.f32.mrf.mxu3 }
 0x15a   :  { %v432_v28 = vrot.slane %v413_v27, 7  ;;  %v543_v27 = vrot.slane %v471_v5, 2 }
 0x15c   :  { %v433_v31 = vsel %vm347_vm1, %v400_v26, %v432_v28  ;;  %v428_v32 = vpop.f32.mrf.mxu0 }
 0x15d   :  { %v435_v34 = vadd.f32 %v433_v31, %v386_v30 }
 0x15f   :  { %v1100_v36 = vmul.f32 -1.442695, %v435_v34 }
 0x161   :  { %1155 = vpow2.f32 %v1100_v36  ;;  %v402_v37 = vpop.f32.mrf.mxu2  ;;  %v415_v39 = vpop.f32.mrf.mxu3 }
 0x167   :  { %v1156_v40 = vpop.eup %1155 }
 0x168   :  { %v439_v41 = vadd.f32 1.0, %v1156_v40 }
 0x16a   :  { %1157 = vrcp.f32 %v439_v41  ;;  %v451_v45 = vand.u32 2147483648, %v439_v41  ;;  %v449_v47 = vand.u32 2147483647, %v439_v41  ;;  %vm445_vm7 = vweird.f32 %v439_v41 }
 0x16c   :  { %v452_v49 = vor.u32 1.1754944e-38, %v451_v45  ;;  %vm450_vm9 = vcmp.eq.f32.partialorder %v449_v47, 8.507059e+37 }
 0x170   :  { %v1158_v42 = vpop.eup %1157 }
 0x171   :  { %v441_v43 = vmul.f32 %v1158_v42, %v439_v41  ;;  %vm446_vm6 = vweird.f32 %v1158_v42 }
 0x172   :  { %vm447_vm8 = vmor %vm445_vm7, %vm446_vm6 }
 0x173   :  { %v442_v44 = vsub.f32 1.0, %v441_v43  ;;  %v556_v43 = vld [vmem:[#allocation2 + $0x3] ss:$8 sm:$0x7] }
 0x175   :  { %v443_v46 = vmul.f32 %v1158_v42, %v442_v44 }
 0x177   :  { %v444_v48 = vadd.f32 %v1158_v42, %v443_v46 }
 0x179   :  { %v448_v51 = vsel %vm447_vm8, %v1158_v42, %v444_v48 }
 0x17a   :  { %v453_v52 = vsel %vm450_vm9, %v452_v49, %v448_v51 }
 0x17b   :  { %v456_v53 = vmul.f32 %v455_v50, %v453_v52  ;;  %v463_v56 = vrot.slane %v453_v52, 1 }
 0x17d   :  { %v460_v55 = vadd.f32 %v458_v54, %v456_v53  ;;  %v465_v57 = vsub.f32 1.0, %v463_v56  ;;  %v467_v60 = vmul.f32 %v463_v56, %v383_v22 }
 0x17f   :  { %1159 = vtanh.f32 %v460_v55 }
 0x185   :  { %v1160_v58 = vpop.eup %1159 }
 0x186   :  { %v466_v59 = vmul.f32 %v1160_v58, %v465_v57 }
 0x188   :  { %v468_v61 = vadd.f32 %v467_v60, %v466_v59 }
 0x18a   :  { %469 = vst [vmem:[#allocation8 + $0x1] sm:$0x1] %v468_v61  ;;  %v472_v62 = vpack.c.bf16 %v468_v61, %v468_v61 }
 0x18c   :  { %1101 = vmatmul.msk.bf16.vlgmr.msra.gmra.mxu1 %vm111_vm0, %v472_v62  ;;  %1102 = vmatmul.msk.bf16.vlgmr.msra.gmra.mxu2 %vm111_vm0, %v472_v62 }
 0x18d   :  { %1103 = vmatmul.msk.bf16.vlgmr.msra.gmra.mxu3 %vm111_vm0, %v472_v62  ;;  %678 = vmatpush.bf16.msra.mxu1 %v1404_v33 }
 0x18e   :  { %750 = vmatpush.bf16.msra.mxu3 %v1395_v25  ;;  %737 = vmatpush.bf16.msra.mxu2 %v1383_v17 }
 0x191   :  { %679 = vmatpush.bf16.msra.mxu1 %v1417_v38 }
 0x192   :  { %751 = vmatpush.bf16.msra.mxu3 %v1409_v35  ;;  %738 = vmatpush.bf16.msra.mxu2 %v1402_v29 }
 0x209   :  { %v485_v63 = vpop.f32.mrf.mxu1 }
 0x20f   :  { %v498_v0 = vpop.f32.mrf.mxu2 }
 0x210   :  { %v517_v1 = vrot.slane %v498_v0, 7  ;;  %v511_v2 = vpop.f32.mrf.mxu3 }
 0x211   :  { %v487_v3 = vpop.f32.mrf.mxu1  ;;  %v540_v23 = vadd.f32 %v511_v2, %v1443_v4 }
 0x212   :  { %v518_v6 = vsel %vm347_vm1, %v485_v63, %v517_v1  ;;  %v628_v1 = vrot.slane %v556_v43, 2 }
 0x213   :  { %v520_v7 = vadd.f32 %v518_v6, %v471_v5 }
 0x215   :  { %v1104_v8 = vmul.f32 -1.442695, %v520_v7 }
 0x217   :  { %1161 = vpow2.f32 %v1104_v8  ;;  %v500_v9 = vpop.f32.mrf.mxu2 }
 0x218   :  { %v513_v10 = vpop.f32.mrf.mxu3 }
 0x21d   :  { %v1162_v11 = vpop.eup %1161 }
 0x21e   :  { %v524_v12 = vadd.f32 1.0, %v1162_v11 }
 0x220   :  { %1163 = vrcp.f32 %v524_v12  ;;  %v536_v16 = vand.u32 2147483648, %v524_v12  ;;  %v534_v19 = vand.u32 2147483647, %v524_v12  ;;  %vm530_vm11 = vweird.f32 %v524_v12 }
 0x222   :  { %v537_v21 = vor.u32 1.1754944e-38, %v536_v16  ;;  %vm535_vm13 = vcmp.eq.f32.partialorder %v534_v19, 8.507059e+37 }
 0x226   :  { %v1164_v13 = vpop.eup %1163 }
 0x227   :  { %v526_v14 = vmul.f32 %v1164_v13, %v524_v12  ;;  %vm531_vm10 = vweird.f32 %v1164_v13 }
 0x228   :  { %vm532_vm12 = vmor %vm530_vm11, %vm531_vm10 }
 0x229   :  { %v527_v15 = vsub.f32 1.0, %v526_v14 }
 0x22b   :  { %v528_v18 = vmul.f32 %v1164_v13, %v527_v15  ;;  %v641_v15 = vld [vmem:[#allocation2 + $0x4] ss:$8 sm:$0x7] }
 0x22d   :  { %v529_v20 = vadd.f32 %v1164_v13, %v528_v18 }
 0x22f   :  { %v533_v22 = vsel %vm532_vm12, %v1164_v13, %v529_v20 }
 0x230   :  { %v538_v24 = vsel %vm535_vm13, %v537_v21, %v533_v22 }
 0x231   :  { %v541_v26 = vmul.f32 %v540_v23, %v538_v24  ;;  %v548_v30 = vrot.slane %v538_v24, 1 }
 0x233   :  { %v545_v28 = vadd.f32 %v543_v27, %v541_v26  ;;  %v550_v31 = vsub.f32 1.0, %v548_v30  ;;  %v552_v36 = vmul.f32 %v548_v30, %v468_v61 }
 0x235   :  { %1165 = vtanh.f32 %v545_v28 }
 0x23b   :  { %v1166_v32 = vpop.eup %1165 }
 0x23c   :  { %v551_v34 = vmul.f32 %v1166_v32, %v550_v31 }
 0x23e   :  { %v553_v37 = vadd.f32 %v552_v36, %v551_v34 }
 0x240   :  { %554 = vst [vmem:[#allocation8 + $0x2] sm:$0x1] %v553_v37  ;;  %v557_v39 = vpack.c.bf16 %v553_v37, %v553_v37 }
 0x242   :  { %1105 = vmatmul.msk.bf16.vlgmr.msrb.gmra.mxu0 %vm111_vm0, %v557_v39  ;;  %1106 = vmatmul.msk.bf16.vlgmr.msrb.gmra.mxu1 %vm111_vm0, %v557_v39 }
 0x243   :  { %1107 = vmatmul.msk.bf16.vlgmr.msrb.gmra.mxu2 %vm111_vm0, %v557_v39  ;;  %763 = vmatpush.bf16.msrb.mxu0 %v1404_v33 }
 0x244   :  { %835 = vmatpush.bf16.msrb.mxu2 %v1395_v25  ;;  %822 = vmatpush.bf16.msrb.mxu1 %v1383_v17 }
 0x247   :  { %764 = vmatpush.bf16.msrb.mxu0 %v1417_v38 }
 0x248   :  { %836 = vmatpush.bf16.msrb.mxu2 %v1409_v35  ;;  %823 = vmatpush.bf16.msrb.mxu1 %v1402_v29 }
 0x2bf   :  { %v570_v40 = vpop.f32.mrf.mxu0  ;;  %v583_v41 = vpop.f32.mrf.mxu1 }
 0x2c0   :  { %v602_v42 = vrot.slane %v583_v41, 7 }
 0x2c2   :  { %v603_v44 = vsel %vm347_vm1, %v570_v40, %v602_v42 }
 0x2c3   :  { %v605_v45 = vadd.f32 %v603_v44, %v556_v43 }
 0x2c5   :  { %v1108_v46 = vmul.f32 -1.442695, %v605_v45 }
 0x2c6   :  { %v596_v47 = vpop.f32.mrf.mxu2 }
 0x2c7   :  { %1167 = vpow2.f32 %v1108_v46  ;;  %v572_v48 = vpop.f32.mrf.mxu0  ;;  %v585_v49 = vpop.f32.mrf.mxu1  ;;  %v625_v62 = vadd.f32 %v596_v47, %v1443_v4 }
 0x2cd   :  { %v1168_v50 = vpop.eup %1167 }
 0x2ce   :  { %v609_v51 = vadd.f32 1.0, %v1168_v50  ;;  %v598_v52 = vpop.f32.mrf.mxu2 }
 0x2d0   :  { %1169 = vrcp.f32 %v609_v51  ;;  %v621_v56 = vand.u32 2147483648, %v609_v51  ;;  %v619_v58 = vand.u32 2147483647, %v609_v51  ;;  %vm615_vm15 = vweird.f32 %v609_v51 }
 0x2d2   :  { %v622_v60 = vor.u32 1.1754944e-38, %v621_v56  ;;  %vm620_vm3 = vcmp.eq.f32.partialorder %v619_v58, 8.507059e+37 }
 0x2d6   :  { %v1170_v53 = vpop.eup %1169 }
 0x2d7   :  { %v611_v54 = vmul.f32 %v1170_v53, %v609_v51  ;;  %vm616_vm14 = vweird.f32 %v1170_v53  ;;  %v726_v51 = vld [vmem:[#allocation2 + $0x5] ss:$8 sm:$0x7] }
 0x2d8   :  { %vm617_vm2 = vmor %vm615_vm15, %vm616_vm14 }
 0x2d9   :  { %v612_v55 = vsub.f32 1.0, %v611_v54 }
 0x2db   :  { %v613_v57 = vmul.f32 %v1170_v53, %v612_v55 }
 0x2dd   :  { %v614_v59 = vadd.f32 %v1170_v53, %v613_v57 }
 0x2df   :  { %v618_v61 = vsel %vm617_vm2, %v1170_v53, %v614_v59 }
 0x2e0   :  { %v623_v63 = vsel %vm620_vm3, %v622_v60, %v618_v61 }
 0x2e1   :  { %v626_v0 = vmul.f32 %v625_v62, %v623_v63  ;;  %v633_v3 = vrot.slane %v623_v63, 1 }
 0x2e3   :  { %v630_v2 = vadd.f32 %v628_v1, %v626_v0  ;;  %v635_v5 = vsub.f32 1.0, %v633_v3  ;;  %v637_v8 = vmul.f32 %v633_v3, %v553_v37  ;;  %v713_v37 = vrot.slane %v641_v15, 2 }
 0x2e5   :  { %1171 = vtanh.f32 %v630_v2 }
 0x2eb   :  { %v1172_v6 = vpop.eup %1171 }
 0x2ec   :  { %v636_v7 = vmul.f32 %v1172_v6, %v635_v5 }
 0x2ee   :  { %v638_v9 = vadd.f32 %v637_v8, %v636_v7  ;;  %v798_v7 = vrot.slane %v726_v51, 2 }
 0x2f0   :  { %639 = vst [vmem:[#allocation8 + $0x3] sm:$0x1] %v638_v9  ;;  %v642_v10 = vpack.c.bf16 %v638_v9, %v638_v9 }
 0x2f2   :  { %1109 = vmatmul.msk.bf16.vlgmr.msrb.gmra.mxu3 %vm111_vm0, %v642_v10  ;;  %1110 = vmatmul.msk.bf16.vlgmr.msra.gmra.mxu0 %vm111_vm0, %v642_v10 }
 0x2f3   :  { %1111 = vmatmul.msk.bf16.vlgmr.msra.gmra.mxu1 %vm111_vm0, %v642_v10  ;;  %848 = vmatpush.bf16.msrb.mxu3 %v1404_v33 }
 0x2f4   :  { %920 = vmatpush.bf16.msra.mxu1 %v1395_v25  ;;  %907 = vmatpush.bf16.msra.mxu0 %v1383_v17 }
 0x2f7   :  { %849 = vmatpush.bf16.msrb.mxu3 %v1417_v38 }
 0x2f8   :  { %921 = vmatpush.bf16.msra.mxu1 %v1409_v35  ;;  %908 = vmatpush.bf16.msra.mxu0 %v1402_v29 }
 0x36f   :  { %v668_v11 = vpop.f32.mrf.mxu0 }
 0x370   :  { %v681_v12 = vpop.f32.mrf.mxu1  ;;  %v687_v13 = vrot.slane %v668_v11, 7 }
 0x371   :  { %v710_v31 = vadd.f32 %v681_v12, %v1443_v4 }
 0x375   :  { %v655_v14 = vpop.f32.mrf.mxu3 }
 0x376   :  { %v688_v16 = vsel %vm347_vm1, %v655_v14, %v687_v13 }
 0x377   :  { %v690_v18 = vadd.f32 %v688_v16, %v641_v15  ;;  %v670_v19 = vpop.f32.mrf.mxu0 }
 0x378   :  { %v683_v20 = vpop.f32.mrf.mxu1 }
 0x379   :  { %v1112_v21 = vmul.f32 -1.442695, %v690_v18 }
 0x37b   :  { %1173 = vpow2.f32 %v1112_v21 }
 0x37d   :  { %v657_v25 = vpop.f32.mrf.mxu3 }
 0x37e   :  { %v811_v25 = vld [vmem:[#allocation2 + $0x6] ss:$8 sm:$0x7] }
 0x381   :  { %v1174_v17 = vpop.eup %1173 }
 0x382   :  { %v694_v22 = vadd.f32 1.0, %v1174_v17 }
 0x384   :  { %1175 = vrcp.f32 %v694_v22  ;;  %v706_v29 = vand.u32 2147483648, %v694_v22  ;;  %v704_v27 = vand.u32 2147483647, %v694_v22  ;;  %vm700_vm5 = vweird.f32 %v694_v22 }
 0x386   :  { %v707_v30 = vor.u32 1.1754944e-38, %v706_v29  ;;  %vm705_vm7 = vcmp.eq.f32.partialorder %v704_v27, 8.507059e+37 }
 0x38a   :  { %v1176_v23 = vpop.eup %1175 }
 0x38b   :  { %v696_v35 = vmul.f32 %v1176_v23, %v694_v22  ;;  %vm701_vm4 = vweird.f32 %v1176_v23 }
 0x38c   :  { %vm702_vm6 = vmor %vm700_vm5, %vm701_vm4 }
 0x38d   :  { %v697_v24 = vsub.f32 1.0, %v696_v35 }
 0x38f   :  { %v698_v26 = vmul.f32 %v1176_v23, %v697_v24 }
 0x391   :  { %v699_v28 = vadd.f32 %v1176_v23, %v698_v26 }
 0x393   :  { %v703_v32 = vsel %vm702_vm6, %v1176_v23, %v699_v28 }
 0x394   :  { %v708_v34 = vsel %vm705_vm7, %v707_v30, %v703_v32 }
 0x395   :  { %v711_v36 = vmul.f32 %v710_v31, %v708_v34  ;;  %v718_v40 = vrot.slane %v708_v34, 1 }
 0x397   :  { %v715_v39 = vadd.f32 %v713_v37, %v711_v36  ;;  %v720_v41 = vsub.f32 1.0, %v718_v40  ;;  %v722_v44 = vmul.f32 %v718_v40, %v638_v9 }
 0x399   :  { %1177 = vtanh.f32 %v715_v39 }
 0x39f   :  { %v1178_v42 = vpop.eup %1177 }
 0x3a0   :  { %v721_v43 = vmul.f32 %v1178_v42, %v720_v41 }
 0x3a2   :  { %v723_v45 = vadd.f32 %v722_v44, %v721_v43  ;;  %v883_v43 = vrot.slane %v811_v25, 2 }
 0x3a4   :  { %724 = vst [vmem:[#allocation8 + $0x4] sm:$0x1] %v723_v45  ;;  %v727_v46 = vpack.c.bf16 %v723_v45, %v723_v45 }
 0x3a6   :  { %1113 = vmatmul.msk.bf16.vlgmr.msra.gmra.mxu2 %vm111_vm0, %v727_v46  ;;  %1114 = vmatmul.msk.bf16.vlgmr.msra.gmra.mxu3 %vm111_vm0, %v727_v46 }
 0x3a7   :  { %1115 = vmatmul.msk.bf16.vlgmr.msrb.gmra.mxu0 %vm111_vm0, %v727_v46  ;;  %933 = vmatpush.bf16.msra.mxu2 %v1404_v33 }
 0x3ab   :  { %934 = vmatpush.bf16.msra.mxu2 %v1417_v38 }
 0x424   :  { %v766_v47 = vpop.f32.mrf.mxu0 }
 0x425   :  { %v795_v2 = vadd.f32 %v766_v47, %v1443_v4 }
 0x429   :  { %v740_v48 = vpop.f32.mrf.mxu2  ;;  %v753_v49 = vpop.f32.mrf.mxu3 }
 0x42a   :  { %v772_v50 = vrot.slane %v753_v49, 7 }
 0x42c   :  { %v773_v52 = vsel %vm347_vm1, %v740_v48, %v772_v50  ;;  %v768_v53 = vpop.f32.mrf.mxu0 }
 0x42d   :  { %v775_v54 = vadd.f32 %v773_v52, %v726_v51 }
 0x42f   :  { %v1116_v55 = vmul.f32 -1.442695, %v775_v54 }
 0x431   :  { %1179 = vpow2.f32 %v1116_v55  ;;  %v742_v56 = vpop.f32.mrf.mxu2  ;;  %v755_v57 = vpop.f32.mrf.mxu3  ;;  %v896_v55 = vld [vmem:[#allocation2 + $0x7] ss:$8 sm:$0x7] }
 0x437   :  { %v1180_v58 = vpop.eup %1179 }
 0x438   :  { %v779_v59 = vadd.f32 1.0, %v1180_v58 }
 0x43a   :  { %1181 = vrcp.f32 %v779_v59  ;;  %v791_v38 = vand.u32 2147483648, %v779_v59  ;;  %v789_v63 = vand.u32 2147483647, %v779_v59  ;;  %vm785_vm9 = vweird.f32 %v779_v59 }
 0x43c   :  { %v792_v1 = vor.u32 1.1754944e-38, %v791_v38  ;;  %vm790_vm11 = vcmp.eq.f32.partialorder %v789_v63, 8.507059e+37 }
 0x440   :  { %v1182_v60 = vpop.eup %1181 }
 0x441   :  { %v781_v33 = vmul.f32 %v1182_v60, %v779_v59  ;;  %vm786_vm8 = vweird.f32 %v1182_v60 }
 0x442   :  { %vm787_vm10 = vmor %vm785_vm9, %vm786_vm8 }
 0x443   :  { %v782_v61 = vsub.f32 1.0, %v781_v33 }
 0x445   :  { %v783_v62 = vmul.f32 %v1182_v60, %v782_v61 }
 0x447   :  { %v784_v0 = vadd.f32 %v1182_v60, %v783_v62 }
 0x449   :  { %v788_v3 = vsel %vm787_vm10, %v1182_v60, %v784_v0 }
 0x44a   :  { %v793_v5 = vsel %vm790_vm11, %v792_v1, %v788_v3 }
 0x44b   :  { %v796_v6 = vmul.f32 %v795_v2, %v793_v5  ;;  %v803_v9 = vrot.slane %v793_v5, 1 }
 0x44d   :  { %v800_v8 = vadd.f32 %v798_v7, %v796_v6  ;;  %v805_v10 = vsub.f32 1.0, %v803_v9  ;;  %v807_v13 = vmul.f32 %v803_v9, %v723_v45 }
 0x44f   :  { %1183 = vtanh.f32 %v800_v8 }
 0x455   :  { %v1184_v11 = vpop.eup %1183 }
 0x456   :  { %v806_v12 = vmul.f32 %v1184_v11, %v805_v10 }
 0x458   :  { %v808_v14 = vadd.f32 %v807_v13, %v806_v12  ;;  %v968_v12 = vrot.slane %v896_v55, 2 }
 0x45a   :  { %809 = vst [vmem:[#allocation8 + $0x5] sm:$0x1] %v808_v14  ;;  %v812_v15 = vpack.c.bf16 %v808_v14, %v808_v14 }
 0x45c   :  { %1117 = vmatmul.msk.bf16.vlgmr.msrb.gmra.mxu1 %vm111_vm0, %v812_v15  ;;  %1118 = vmatmul.msk.bf16.vlgmr.msrb.gmra.mxu2 %vm111_vm0, %v812_v15 }
 0x45d   :  { %1119 = vmatmul.msk.bf16.vlgmr.msrb.gmra.mxu3 %vm111_vm0, %v812_v15 }
 0x4d9   :  { %v825_v16 = vpop.f32.mrf.mxu1 }
 0x4df   :  { %v838_v18 = vpop.f32.mrf.mxu2 }
 0x4e0   :  { %v857_v19 = vrot.slane %v838_v18, 7  ;;  %v851_v20 = vpop.f32.mrf.mxu3 }
 0x4e1   :  { %v827_v21 = vpop.f32.mrf.mxu1  ;;  %v880_v40 = vadd.f32 %v851_v20, %v1443_v4 }
 0x4e2   :  { %v858_v17 = vsel %vm347_vm1, %v825_v16, %v857_v19 }
 0x4e3   :  { %v860_v22 = vadd.f32 %v858_v17, %v811_v25 }
 0x4e5   :  { %v1120_v23 = vmul.f32 -1.442695, %v860_v22 }
 0x4e7   :  { %1185 = vpow2.f32 %v1120_v23  ;;  %v840_v35 = vpop.f32.mrf.mxu2 }
 0x4e8   :  { %v853_v24 = vpop.f32.mrf.mxu3 }
 0x4ed   :  { %v1186_v29 = vpop.eup %1185 }
 0x4ee   :  { %v864_v26 = vadd.f32 1.0, %v1186_v29 }
 0x4f0   :  { %1187 = vrcp.f32 %v864_v26  ;;  %v876_v31 = vand.u32 2147483648, %v864_v26  ;;  %v874_v34 = vand.u32 2147483647, %v864_v26  ;;  %vm870_vm13 = vweird.f32 %v864_v26 }
 0x4f2   :  { %v877_v37 = vor.u32 1.1754944e-38, %v876_v31  ;;  %vm875_vm15 = vcmp.eq.f32.partialorder %v874_v34, 8.507059e+37 }
 0x4f6   :  { %v1188_v27 = vpop.eup %1187 }
 0x4f7   :  { %v866_v28 = vmul.f32 %v1188_v27, %v864_v26  ;;  %vm871_vm12 = vweird.f32 %v1188_v27 }
 0x4f8   :  { %vm872_vm14 = vmor %vm870_vm13, %vm871_vm12 }
 0x4f9   :  { %v867_v30 = vsub.f32 1.0, %v866_v28 }
 0x4fb   :  { %v868_v32 = vmul.f32 %v1188_v27, %v867_v30 }
 0x4fd   :  { %v869_v36 = vadd.f32 %v1188_v27, %v868_v32 }
 0x4ff   :  { %v873_v39 = vsel %vm872_vm14, %v1188_v27, %v869_v36 }
 0x500   :  { %v878_v41 = vsel %vm875_vm15, %v877_v37, %v873_v39 }
 0x501   :  { %v881_v42 = vmul.f32 %v880_v40, %v878_v41  ;;  %v888_v45 = vrot.slane %v878_v41, 1 }
 0x503   :  { %v885_v44 = vadd.f32 %v883_v43, %v881_v42  ;;  %v890_v46 = vsub.f32 1.0, %v888_v45  ;;  %v892_v49 = vmul.f32 %v888_v45, %v808_v14 }
 0x505   :  { %1189 = vtanh.f32 %v885_v44 }
 0x50b   :  { %v1190_v47 = vpop.eup %1189 }
 0x50c   :  { %v891_v48 = vmul.f32 %v1190_v47, %v890_v46 }
 0x50e   :  { %v893_v50 = vadd.f32 %v892_v49, %v891_v48 }
 0x510   :  { %894 = vst [vmem:[#allocation8 + $0x6] sm:$0x1] %v893_v50  ;;  %v897_v51 = vpack.c.bf16 %v893_v50, %v893_v50 }
 0x512   :  { %1121 = vmatmul.msk.bf16.vlgmr.msra.gmra.mxu0 %vm111_vm0, %v897_v51  ;;  %1122 = vmatmul.msk.bf16.vlgmr.msra.gmra.mxu1 %vm111_vm0, %v897_v51 }
 0x513   :  { %1123 = vmatmul.msk.bf16.vlgmr.msra.gmra.mxu2 %vm111_vm0, %v897_v51 }
 0x58f   :  { %v910_v52 = vpop.f32.mrf.mxu0  ;;  %v923_v53 = vpop.f32.mrf.mxu1 }
 0x590   :  { %v942_v54 = vrot.slane %v923_v53, 7 }
 0x592   :  { %v943_v56 = vsel %vm347_vm1, %v910_v52, %v942_v54 }
 0x593   :  { %v945_v57 = vadd.f32 %v943_v56, %v896_v55 }
 0x595   :  { %v1124_v58 = vmul.f32 -1.442695, %v945_v57 }
 0x596   :  { %v936_v59 = vpop.f32.mrf.mxu2 }
 0x597   :  { %1191 = vpow2.f32 %v1124_v58  ;;  %v912_v60 = vpop.f32.mrf.mxu0  ;;  %v925_v33 = vpop.f32.mrf.mxu1  ;;  %v965_v9 = vadd.f32 %v936_v59, %v1443_v4 }
 0x59d   :  { %v1192_v61 = vpop.eup %1191 }
 0x59e   :  { %v949_v38 = vadd.f32 1.0, %v1192_v61  ;;  %v938_v62 = vpop.f32.mrf.mxu2 }
 0x5a0   :  { %1193 = vrcp.f32 %v949_v38  ;;  %v961_v2 = vand.u32 2147483648, %v949_v38  ;;  %v959_v5 = vand.u32 2147483647, %v949_v38  ;;  %vm955_vm2 = vweird.f32 %v949_v38 }
 0x5a2   :  { %v962_v7 = vor.u32 1.1754944e-38, %v961_v2  ;;  %vm960_vm3 = vcmp.eq.f32.partialorder %v959_v5, 8.507059e+37 }
 0x5a6   :  { %v1194_v63 = vpop.eup %1193 }
 0x5a7   :  { %v951_v0 = vmul.f32 %v1194_v63, %v949_v38  ;;  %vm956_vm0 = vweird.f32 %v1194_v63 }
 0x5a8   :  { %vm957_vm1 = vmor %vm955_vm2, %vm956_vm0 }
 0x5a9   :  { %v952_v1 = vsub.f32 1.0, %v951_v0 }
 0x5ab   :  { %v953_v3 = vmul.f32 %v1194_v63, %v952_v1 }
 0x5ad   :  { %v954_v6 = vadd.f32 %v1194_v63, %v953_v3 }
 0x5af   :  { %v958_v8 = vsel %vm957_vm1, %v1194_v63, %v954_v6 }
 0x5b0   :  { %v963_v10 = vsel %vm960_vm3, %v962_v7, %v958_v8 }
 0x5b1   :  { %v966_v11 = vmul.f32 %v965_v9, %v963_v10  ;;  %v973_v14 = vrot.slane %v963_v10, 1 }
 0x5b3   :  { %v970_v13 = vadd.f32 %v968_v12, %v966_v11  ;;  %v975_v15 = vsub.f32 1.0, %v973_v14  ;;  %v977_v19 = vmul.f32 %v973_v14, %v893_v50 }
 0x5b5   :  { %1195 = vtanh.f32 %v970_v13 }
 0x5bb   :  { %v1196_v16 = vpop.eup %1195 }
 0x5bc   :  { %v976_v18 = vmul.f32 %v1196_v16, %v975_v15 }
 0x5be   :  { %v978_v4 = vadd.f32 %v977_v19, %v976_v18 }
 0x5c0   :  { %979 = vst [vmem:[#allocation8 + $0x7] sm:$0x1] %v978_v4 }
 0x5c1   :  { %980 = vst [vmem:[#allocation9] sm:$0x1] %v978_v4  ;;  %991 = dma.vmem_to_hbm [thread:$0]  %s987_s5, 128, %s989_s16, [#allocation5]  }
 0x5c2   :  { %1002 = dma.vmem_to_hbm [thread:$0]  %s998_s18, 16, %s1000_s21, [#allocation10]  }
 0x5c3   :  { %1297 = dma.done.wait [#allocation5], 128  }
 0x5c4   :  { %1298 = vsyncadd [#allocation5], 4294967168 }
 0x5c5   :  { %1299 = dma.done.wait [#allocation10], 16  }
 0x5c6   :  { %1300 = vsyncadd [#allocation10], 4294967280 }
 0x5c7   :  { %1011 = vsyncpa [#allocation4], 1 }
 0x5c8   :  { %1012 = vsyncpa [#allocation7], 1 }
 0x5c9   :  { %1013 = vsyncpa [#allocation5], 1 }
 0x5ca   :  { %1014 = vsyncpa [#allocation10], 1 }

</bundles_post_ra>
